<compile_context>
chip_gen: v7x
topology: tpu7x:2x2x1
jax: 0.10.0
libtpu: 0.0.40
codegen_flags: <defaults>
</compile_context>

<pallas_src>
import jax
import jax.numpy as jnp
import numpy as np
from jax.experimental import pallas as pl
from jax.experimental.pallas import tpu as pltpu


def _round_up(x, m):
    return (x + m - 1) // m * m


# ----------------------------- Pallas kernel ------------------------------- #
def _gru_kernel(len_ref, x_ref, wih_ref, whh_ref, bih_ref, bhh_ref,
                o_ref, xg_ref):
    """Full GRU recurrence in one kernel invocation.

    len_ref : (Bp, 1)    int32  per-row sequence lengths (0 for padded rows)
    x_ref   : (T*Bp, Dp) f32    time-major, batch-flattened inputs
    wih_ref : (Dp, 3*Dp) f32    fused input->gate weights, gate order (r,z,n)
    whh_ref : (Dp, 3*Dp) f32    fused hidden->gate weights
    bih_ref : (1, 3*Dp)  f32    input-side bias
    bhh_ref : (1, 3*Dp)  f32    hidden-side bias
    o_ref   : (T, Bp, Dp) f32   time-major outputs (zeroed past each length)
    xg_ref  : (T*Bp, 3*Dp) f32  VMEM scratch: precomputed input-side gates
    """
    T, Bp, Dp = o_ref.shape

    # Input-side gates for every timestep in ONE MXU matmul (they do not
    # depend on the hidden state).
    xg_ref[...] = (jnp.dot(x_ref[...], wih_ref[...],
                           preferred_element_type=jnp.float32)
                   + bih_ref[...])

    whh = whh_ref[...]                       # hoisted out of the serial loop
    bhh = bhh_ref[...]
    lens = len_ref[...]                      # (Bp, 1) int32, loaded once

    def step(t, h):
        off = pl.multiple_of(t * Bp, Bp)
        xg = xg_ref[pl.ds(off, Bp), :]                            # (Bp, 3Dp)
        hg = jnp.dot(h, whh, preferred_element_type=jnp.float32) + bhh
        r = jax.nn.sigmoid(xg[:, 0:Dp] + hg[:, 0:Dp])
        z = jax.nn.sigmoid(xg[:, Dp:2 * Dp] + hg[:, Dp:2 * Dp])
        n = jnp.tanh(xg[:, 2 * Dp:3 * Dp] + r * hg[:, 2 * Dp:3 * Dp])
        h_new = (1.0 - z) * n + z * h
        # pack/pad_packed_sequence semantics: outputs past a row's length are
        # 0.0.  (Per-step hidden-state freezing is unnecessary for the
        # returned outputs: once t >= length, every later output of that row
        # is zeroed anyway, and the final hidden state is discarded.)
        o_ref[t] = jnp.where(t < lens, h_new, 0.0).astype(o_ref.dtype)
        return h_new

    jax.lax.fori_loop(0, T, step, jnp.zeros((Bp, Dp), jnp.float32),
                      unroll=True)


def gru_pallas(keys, lengths, packed_params):
    """keys: (B, T, D), lengths: (B,) int. Returns (B, T, D)."""
    B, T, D = keys.shape
    wih, whh, bih, bhh = packed_params
    Dp = wih.shape[0]                         # lane-padded hidden size
    Bp = _round_up(max(B, 1), 8)              # sublane-padded batch

    # Zero padding is inert: padded weight rows/cols and bias entries are 0,
    # so padded hidden dims stay exactly 0 through the recurrence.
    x = jnp.zeros((Bp, T, Dp), jnp.float32).at[:B, :, :D].set(
        keys.astype(jnp.float32))
    x_flat = jnp.transpose(x, (1, 0, 2)).reshape(T * Bp, Dp)   # time-major
    len_p = jnp.zeros((Bp, 1), jnp.int32).at[:B, 0].set(
        lengths.astype(jnp.int32))

    vmem = pl.BlockSpec(memory_space=pltpu.MemorySpace.VMEM)
    out = pl.pallas_call(
        _gru_kernel,
        out_shape=jax.ShapeDtypeStruct((T, Bp, Dp), jnp.float32),
        in_specs=[vmem] * 6,
        out_specs=vmem,
        scratch_shapes=[pltpu.VMEM((T * Bp, 3 * Dp), jnp.float32)],
    )(len_p, x_flat, wih, whh, bih, bhh)

    out = jnp.transpose(out, (1, 0, 2))[:B, :, :D]
    return out.astype(keys.dtype)


# ------------------------------- parameters -------------------------------- #
def init_gru_params(key, D, init_std=1e-3):
    """Matches nn.GRU(D, D) after the module's normal_(std=init_std) on
    weights. Biases keep PyTorch's default U(-1/sqrt(D), 1/sqrt(D)) init (only
    params whose name contains 'weight' are re-initialized).  Returns raw
    PyTorch-layout tensors: w_ih, w_hh (3D, D); b_ih, b_hh (3D,)."""
    k1, k2, k3, k4 = jax.random.split(key, 4)
    w_ih = init_std * jax.random.normal(k1, (3 * D, D), jnp.float32)
    w_hh = init_std * jax.random.normal(k2, (3 * D, D), jnp.float32)
    bound = 1.0 / np.sqrt(D)
    b_ih = jax.random.uniform(k3, (3 * D,), jnp.float32, -bound, bound)
    b_hh = jax.random.uniform(k4, (3 * D,), jnp.float32, -bound, bound)
    return w_ih, w_hh, b_ih, b_hh


def pack_gru_params(raw_params, D, lane=128):
    """Pack PyTorch-layout GRU params into the fused, lane-padded kernel
    layout: weights (Dp, 3*Dp) in x@W form with the 3 gates side by side
    (each padded to Dp lanes), biases (1, 3*Dp).  Padding is zero."""
    w_ih, w_hh, b_ih, b_hh = raw_params
    Dp = _round_up(D, lane)

    def pack_w(w):                            # (3D, D) -> (Dp, 3*Dp)
        out = np.zeros((Dp, 3 * Dp), np.float32)
        w = np.asarray(w, np.float32)
        for g in range(3):
            out[:D, g * Dp:g * Dp + D] = w[g * D:(g + 1) * D].T
        return jnp.asarray(out)

    def pack_b(b):                            # (3D,) -> (1, 3*Dp)
        out = np.zeros((1, 3 * Dp), np.float32)
        b = np.asarray(b, np.float32)
        for g in range(3):
            out[0, g * Dp:g * Dp + D] = b[g * D:(g + 1) * D]
        return jnp.asarray(out)

    return pack_w(w_ih), pack_w(w_hh), pack_b(b_ih), pack_b(b_hh)


# ------------------------------ module wrapper ------------------------------ #
def interest_extractor_forward(keys, keys_length, packed_params):
    """Mirrors InterestExtractor.forward with use_neg=False."""
    B, T, D = keys.shape
    zero_outputs = jnp.zeros((B, D), keys.dtype)
    aux_loss = jnp.zeros((1,), jnp.float32)

    # torch.masked_select-equivalent batch compaction is shape-dynamic; it is
    # eager JAX glue (not jit-compatible, exactly like the PyTorch op).
    mask = keys_length > 0
    idx = jnp.nonzero(mask)[0]
    if int(idx.shape[0]) == 0:
        # Faithful to the PyTorch module: empty-mask path returns a 1-tuple.
        return (zero_outputs,)

    masked_keys = keys[idx]                    # (Bm, T, D)
    masked_len = keys_length[idx]              # (Bm,)
    interests = gru_pallas(masked_keys, masked_len, packed_params)
    # TODO(synk): auxiliary_net / _cal_auxiliary_loss only exists when
    # use_neg=True; not constructed here (default use_neg=False).
    return (interests, aux_loss)


# ------------------------------ pure-JAX check ------------------------------ #
def gru_reference(keys, lengths, raw_params):
    w_ih, w_hh, b_ih, b_hh = raw_params
    B, T, D = keys.shape
    wih = [w_ih[g * D:(g + 1) * D].T for g in range(3)]
    whh = [w_hh[g * D:(g + 1) * D].T for g in range(3)]
    bih = [b_ih[g * D:(g + 1) * D] for g in range(3)]
    bhh = [b_hh[g * D:(g + 1) * D] for g in range(3)]

    def step(h, inp):
        xt, t = inp
        i = [xt @ wih[g] + bih[g] for g in range(3)]
        hh = [h @ whh[g] + bhh[g] for g in range(3)]
        r = jax.nn.sigmoid(i[0] + hh[0])
        z = jax.nn.sigmoid(i[1] + hh[1])
        n = jnp.tanh(i[2] + r * hh[2])
        h_new = (1.0 - z) * n + z * h
        valid = (t < lengths).astype(jnp.float32)[:, None]
        return valid * h_new + (1.0 - valid) * h, valid * h_new

    h0 = jnp.zeros((B, D), jnp.float32)
    _, ys = jax.lax.scan(step, h0,
                         (jnp.transpose(keys, (1, 0, 2)), jnp.arange(T)))
    return jnp.transpose(ys, (1, 0, 2))


# ----------------------------------- main ----------------------------------- #
if __name__ == "__main__":
    B, T, D = 3, 8, 32                        # batch, max seq len, embedding
    key = jax.random.PRNGKey(0)
    kp, kx = jax.random.split(key)

    raw_params = init_gru_params(kp, D, init_std=1e-3)
    packed_params = pack_gru_params(raw_params, D)

    keys = jax.random.normal(kx, (B, T, D), jnp.float32)
    keys_length = jnp.array([5, 0, 8], jnp.int32)   # row 1 is dropped

    interests, aux_loss = interest_extractor_forward(keys, keys_length,
                                                     packed_params)
    jax.block_until_ready(interests)
    jax.block_until_ready(aux_loss)

    # verify against a pure-JAX reference on the masked batch
    idx = jnp.nonzero(keys_length > 0)[0]
    ref = gru_reference(keys[idx], keys_length[idx], raw_params)
    np.testing.assert_allclose(np.asarray(interests), np.asarray(ref),
                               rtol=1e-5, atol=1e-5)
    assert interests.shape == (int(idx.shape[0]), T, D)
    assert aux_loss.shape == (1,) and float(aux_loss[0]) == 0.0

    print("KERNEL_OK")
</pallas_src>

<mosaic_0001>
module attributes {stable_mosaic.version = 11 : i64} {
  func.func @_gru_kernel(%arg0: memref<8x1xi32, #tpu.memory_space<vmem>>, %arg1: memref<64x128xf32, #tpu.memory_space<vmem>>, %arg2: memref<128x384xf32, #tpu.memory_space<vmem>>, %arg3: memref<128x384xf32, #tpu.memory_space<vmem>>, %arg4: memref<1x384xf32, #tpu.memory_space<vmem>>, %arg5: memref<1x384xf32, #tpu.memory_space<vmem>>, %arg6: memref<8x8x128xf32, #tpu.memory_space<vmem>>, %arg7: memref<64x384xf32, #tpu.memory_space<vmem>>) attributes {dimension_semantics = [], scalar_prefetch = 0 : i64, scratch_operands = 1 : i64, tpu.core_type = #tpu.core_type<tc>} {
    %c0 = arith.constant 0 : index
    %c0_0 = arith.constant 0 : index
    %0 = vector.load %arg1[%c0, %c0_0] : memref<64x128xf32, #tpu.memory_space<vmem>>, vector<64x128xf32>
    %c0_1 = arith.constant 0 : index
    %c0_2 = arith.constant 0 : index
    %1 = vector.load %arg2[%c0_1, %c0_2] : memref<128x384xf32, #tpu.memory_space<vmem>>, vector<128x384xf32>
    %cst = arith.constant dense<0.000000e+00> : vector<64x384xf32>
    %2 = tpu.matmul %0, %1, %cst {dimension_numbers = #tpu.dot_dimension_numbers<[1], [0], [0], [1], [0, 0, 1, 1], [], []>} : vector<64x128xf32>, vector<128x384xf32>, vector<64x384xf32> -> vector<64x384xf32>
    %c0_3 = arith.constant 0 : index
    %c0_4 = arith.constant 0 : index
    %3 = vector.load %arg4[%c0_3, %c0_4] : memref<1x384xf32, #tpu.memory_space<vmem>>, vector<1x384xf32>
    %4 = vector.broadcast %3 : vector<1x384xf32> to vector<64x384xf32>
    %5 = arith.addf %2, %4 : vector<64x384xf32>
    %c0_5 = arith.constant 0 : index
    %c0_6 = arith.constant 0 : index
    %6 = vector.load %arg7[%c0_5, %c0_6] : memref<64x384xf32, #tpu.memory_space<vmem>>, vector<64x384xf32>
    tpu.vector_store %arg7[%c0_5, %c0_6], %5 {strides = array<i32>} : memref<64x384xf32, #tpu.memory_space<vmem>>, vector<64x384xf32>,
    %c0_7 = arith.constant 0 : index
    %c0_8 = arith.constant 0 : index
    %7 = vector.load %arg3[%c0_7, %c0_8] : memref<128x384xf32, #tpu.memory_space<vmem>>, vector<128x384xf32>
    %c0_9 = arith.constant 0 : index
    %c0_10 = arith.constant 0 : index
    %8 = vector.load %arg5[%c0_9, %c0_10] : memref<1x384xf32, #tpu.memory_space<vmem>>, vector<1x384xf32>
    %c0_11 = arith.constant 0 : index
    %c0_12 = arith.constant 0 : index
    %9 = vector.load %arg0[%c0_11, %c0_12] : memref<8x1xi32, #tpu.memory_space<vmem>>, vector<8x1xi32>
    %cst_13 = arith.constant 0.000000e+00 : f32
    %10 = vector.broadcast %cst_13 : f32 to vector<8x128xf32>
    %c0_i32 = arith.constant 0 : i32
    %c8_i32 = arith.constant 8 : i32
    %11 = arith.muli %c0_i32, %c8_i32 : i32
    %12 = tpu.assume_multiple %11, 8 : i32
    %13 = arith.index_cast %12 : i32 to index
    %c0_14 = arith.constant 0 : index
    %14 = vector.load %arg7[%13, %c0_14] : memref<64x384xf32, #tpu.memory_space<vmem>>, vector<8x384xf32>
    %cst_15 = arith.constant dense<0.000000e+00> : vector<8x384xf32>
    %15 = tpu.matmul %10, %7, %cst_15 {dimension_numbers = #tpu.dot_dimension_numbers<[1], [0], [0], [1], [0, 0, 1, 1], [], []>} : vector<8x128xf32>, vector<128x384xf32>, vector<8x384xf32> -> vector<8x384xf32>
    %16 = vector.broadcast %8 : vector<1x384xf32> to vector<8x384xf32>
    %17 = arith.addf %15, %16 : vector<8x384xf32>
    %18 = vector.extract_strided_slice %14 {offsets = [0, 0], sizes = [8, 128], strides = [1, 1]} : vector<8x384xf32> to vector<8x128xf32>
    %19 = vector.extract_strided_slice %17 {offsets = [0, 0], sizes = [8, 128], strides = [1, 1]} : vector<8x384xf32> to vector<8x128xf32>
    %20 = arith.addf %18, %19 : vector<8x128xf32>
    %21 = arith.negf %20 : vector<8x128xf32>
    %22 = math.exp %21 : vector<8x128xf32>
    %cst_16 = arith.constant 1.000000e+00 : f32
    %23 = vector.broadcast %cst_16 : f32 to vector<8x128xf32>
    %24 = arith.addf %23, %22 : vector<8x128xf32>
    %25 = arith.divf %23, %24 : vector<8x128xf32>
    %26 = vector.extract_strided_slice %14 {offsets = [0, 128], sizes = [8, 128], strides = [1, 1]} : vector<8x384xf32> to vector<8x128xf32>
    %27 = vector.extract_strided_slice %17 {offsets = [0, 128], sizes = [8, 128], strides = [1, 1]} : vector<8x384xf32> to vector<8x128xf32>
    %28 = arith.addf %26, %27 : vector<8x128xf32>
    %29 = arith.negf %28 : vector<8x128xf32>
    %30 = math.exp %29 : vector<8x128xf32>
    %cst_17 = arith.constant 1.000000e+00 : f32
    %31 = vector.broadcast %cst_17 : f32 to vector<8x128xf32>
    %32 = arith.addf %31, %30 : vector<8x128xf32>
    %33 = arith.divf %31, %32 : vector<8x128xf32>
    %34 = vector.extract_strided_slice %14 {offsets = [0, 256], sizes = [8, 128], strides = [1, 1]} : vector<8x384xf32> to vector<8x128xf32>
    %35 = vector.extract_strided_slice %17 {offsets = [0, 256], sizes = [8, 128], strides = [1, 1]} : vector<8x384xf32> to vector<8x128xf32>
    %36 = arith.mulf %25, %35 : vector<8x128xf32>
    %37 = arith.addf %34, %36 : vector<8x128xf32>
    %38 = math.tanh %37 : vector<8x128xf32>
    %cst_18 = arith.constant 1.000000e+00 : f32
    %39 = vector.broadcast %cst_18 : f32 to vector<8x128xf32>
    %40 = arith.subf %39, %33 : vector<8x128xf32>
    %41 = arith.mulf %40, %38 : vector<8x128xf32>
    %42 = arith.mulf %33, %10 : vector<8x128xf32>
    %43 = arith.addf %41, %42 : vector<8x128xf32>
    %44 = vector.broadcast %c0_i32 : i32 to vector<8x1xi32>
    %45 = arith.cmpi slt, %44, %9 : vector<8x1xi32>
    %cst_19 = arith.constant 0.000000e+00 : f32
    %46 = vector.shape_cast %45 : vector<8x1xi1> to vector<8x1xi1>
    %47 = vector.broadcast %46 : vector<8x1xi1> to vector<8x128xi1>
    %48 = vector.broadcast %cst_19 : f32 to vector<8x128xf32>
    %49 = arith.select %47, %43, %48 : vector<8x128xi1>, vector<8x128xf32>
    %50 = arith.index_cast %c0_i32 : i32 to index
    %c0_20 = arith.constant 0 : index
    %c0_21 = arith.constant 0 : index
    %51 = vector.load %arg6[%50, %c0_20, %c0_21] : memref<8x8x128xf32, #tpu.memory_space<vmem>>, vector<1x8x128xf32>
    %52 = vector.shape_cast %51 : vector<1x8x128xf32> to vector<8x128xf32>
    %53 = vector.shape_cast %49 : vector<8x128xf32> to vector<1x8x128xf32>
    tpu.vector_store %arg6[%50, %c0_20, %c0_21], %53 {strides = array<i32>} : memref<8x8x128xf32, #tpu.memory_space<vmem>>, vector<1x8x128xf32>,
    %c1_i32 = arith.constant 1 : i32
    %c8_i32_22 = arith.constant 8 : i32
    %54 = arith.muli %c1_i32, %c8_i32_22 : i32
    %55 = tpu.assume_multiple %54, 8 : i32
    %56 = arith.index_cast %55 : i32 to index
    %c0_23 = arith.constant 0 : index
    %57 = vector.load %arg7[%56, %c0_23] : memref<64x384xf32, #tpu.memory_space<vmem>>, vector<8x384xf32>
    %cst_24 = arith.constant dense<0.000000e+00> : vector<8x384xf32>
    %58 = tpu.matmul %43, %7, %cst_24 {dimension_numbers = #tpu.dot_dimension_numbers<[1], [0], [0], [1], [0, 0, 1, 1], [], []>} : vector<8x128xf32>, vector<128x384xf32>, vector<8x384xf32> -> vector<8x384xf32>
    %59 = vector.broadcast %8 : vector<1x384xf32> to vector<8x384xf32>
    %60 = arith.addf %58, %59 : vector<8x384xf32>
    %61 = vector.extract_strided_slice %57 {offsets = [0, 0], sizes = [8, 128], strides = [1, 1]} : vector<8x384xf32> to vector<8x128xf32>
    %62 = vector.extract_strided_slice %60 {offsets = [0, 0], sizes = [8, 128], strides = [1, 1]} : vector<8x384xf32> to vector<8x128xf32>
    %63 = arith.addf %61, %62 : vector<8x128xf32>
    %64 = arith.negf %63 : vector<8x128xf32>
    %65 = math.exp %64 : vector<8x128xf32>
    %cst_25 = arith.constant 1.000000e+00 : f32
    %66 = vector.broadcast %cst_25 : f32 to vector<8x128xf32>
    %67 = arith.addf %66, %65 : vector<8x128xf32>
    %68 = arith.divf %66, %67 : vector<8x128xf32>
    %69 = vector.extract_strided_slice %57 {offsets = [0, 128], sizes = [8, 128], strides = [1, 1]} : vector<8x384xf32> to vector<8x128xf32>
    %70 = vector.extract_strided_slice %60 {offsets = [0, 128], sizes = [8, 128], strides = [1, 1]} : vector<8x384xf32> to vector<8x128xf32>
    %71 = arith.addf %69, %70 : vector<8x128xf32>
    %72 = arith.negf %71 : vector<8x128xf32>
    %73 = math.exp %72 : vector<8x128xf32>
    %cst_26 = arith.constant 1.000000e+00 : f32
    %74 = vector.broadcast %cst_26 : f32 to vector<8x128xf32>
    %75 = arith.addf %74, %73 : vector<8x128xf32>
    %76 = arith.divf %74, %75 : vector<8x128xf32>
    %77 = vector.extract_strided_slice %57 {offsets = [0, 256], sizes = [8, 128], strides = [1, 1]} : vector<8x384xf32> to vector<8x128xf32>
    %78 = vector.extract_strided_slice %60 {offsets = [0, 256], sizes = [8, 128], strides = [1, 1]} : vector<8x384xf32> to vector<8x128xf32>
    %79 = arith.mulf %68, %78 : vector<8x128xf32>
    %80 = arith.addf %77, %79 : vector<8x128xf32>
    %81 = math.tanh %80 : vector<8x128xf32>
    %cst_27 = arith.constant 1.000000e+00 : f32
    %82 = vector.broadcast %cst_27 : f32 to vector<8x128xf32>
    %83 = arith.subf %82, %76 : vector<8x128xf32>
    %84 = arith.mulf %83, %81 : vector<8x128xf32>
    %85 = arith.mulf %76, %43 : vector<8x128xf32>
    %86 = arith.addf %84, %85 : vector<8x128xf32>
    %87 = vector.broadcast %c1_i32 : i32 to vector<8x1xi32>
    %88 = arith.cmpi slt, %87, %9 : vector<8x1xi32>
    %cst_28 = arith.constant 0.000000e+00 : f32
    %89 = vector.shape_cast %88 : vector<8x1xi1> to vector<8x1xi1>
    %90 = vector.broadcast %89 : vector<8x1xi1> to vector<8x128xi1>
    %91 = vector.broadcast %cst_28 : f32 to vector<8x128xf32>
    %92 = arith.select %90, %86, %91 : vector<8x128xi1>, vector<8x128xf32>
    %93 = arith.index_cast %c1_i32 : i32 to index
    %c0_29 = arith.constant 0 : index
    %c0_30 = arith.constant 0 : index
    %94 = vector.load %arg6[%93, %c0_29, %c0_30] : memref<8x8x128xf32, #tpu.memory_space<vmem>>, vector<1x8x128xf32>
    %95 = vector.shape_cast %94 : vector<1x8x128xf32> to vector<8x128xf32>
    %96 = vector.shape_cast %92 : vector<8x128xf32> to vector<1x8x128xf32>
    tpu.vector_store %arg6[%93, %c0_29, %c0_30], %96 {strides = array<i32>} : memref<8x8x128xf32, #tpu.memory_space<vmem>>, vector<1x8x128xf32>,
    %c2_i32 = arith.constant 2 : i32
    %c8_i32_31 = arith.constant 8 : i32
    %97 = arith.muli %c2_i32, %c8_i32_31 : i32
    %98 = tpu.assume_multiple %97, 8 : i32
    %99 = arith.index_cast %98 : i32 to index
    %c0_32 = arith.constant 0 : index
    %100 = vector.load %arg7[%99, %c0_32] : memref<64x384xf32, #tpu.memory_space<vmem>>, vector<8x384xf32>
    %cst_33 = arith.constant dense<0.000000e+00> : vector<8x384xf32>
    %101 = tpu.matmul %86, %7, %cst_33 {dimension_numbers = #tpu.dot_dimension_numbers<[1], [0], [0], [1], [0, 0, 1, 1], [], []>} : vector<8x128xf32>, vector<128x384xf32>, vector<8x384xf32> -> vector<8x384xf32>
    %102 = vector.broadcast %8 : vector<1x384xf32> to vector<8x384xf32>
    %103 = arith.addf %101, %102 : vector<8x384xf32>
    %104 = vector.extract_strided_slice %100 {offsets = [0, 0], sizes = [8, 128], strides = [1, 1]} : vector<8x384xf32> to vector<8x128xf32>
    %105 = vector.extract_strided_slice %103 {offsets = [0, 0], sizes = [8, 128], strides = [1, 1]} : vector<8x384xf32> to vector<8x128xf32>
    %106 = arith.addf %104, %105 : vector<8x128xf32>
    %107 = arith.negf %106 : vector<8x128xf32>
    %108 = math.exp %107 : vector<8x128xf32>
    %cst_34 = arith.constant 1.000000e+00 : f32
    %109 = vector.broadcast %cst_34 : f32 to vector<8x128xf32>
    %110 = arith.addf %109, %108 : vector<8x128xf32>
    %111 = arith.divf %109, %110 : vector<8x128xf32>
    %112 = vector.extract_strided_slice %100 {offsets = [0, 128], sizes = [8, 128], strides = [1, 1]} : vector<8x384xf32> to vector<8x128xf32>
    %113 = vector.extract_strided_slice %103 {offsets = [0, 128], sizes = [8, 128], strides = [1, 1]} : vector<8x384xf32> to vector<8x128xf32>
    %114 = arith.addf %112, %113 : vector<8x128xf32>
    %115 = arith.negf %114 : vector<8x128xf32>
    %116 = math.exp %115 : vector<8x128xf32>
    %cst_35 = arith.constant 1.000000e+00 : f32
    %117 = vector.broadcast %cst_35 : f32 to vector<8x128xf32>
    %118 = arith.addf %117, %116 : vector<8x128xf32>
    %119 = arith.divf %117, %118 : vector<8x128xf32>
    %120 = vector.extract_strided_slice %100 {offsets = [0, 256], sizes = [8, 128], strides = [1, 1]} : vector<8x384xf32> to vector<8x128xf32>
    %121 = vector.extract_strided_slice %103 {offsets = [0, 256], sizes = [8, 128], strides = [1, 1]} : vector<8x384xf32> to vector<8x128xf32>
    %122 = arith.mulf %111, %121 : vector<8x128xf32>
    %123 = arith.addf %120, %122 : vector<8x128xf32>
    %124 = math.tanh %123 : vector<8x128xf32>
    %cst_36 = arith.constant 1.000000e+00 : f32
    %125 = vector.broadcast %cst_36 : f32 to vector<8x128xf32>
    %126 = arith.subf %125, %119 : vector<8x128xf32>
    %127 = arith.mulf %126, %124 : vector<8x128xf32>
    %128 = arith.mulf %119, %86 : vector<8x128xf32>
    %129 = arith.addf %127, %128 : vector<8x128xf32>
    %130 = vector.broadcast %c2_i32 : i32 to vector<8x1xi32>
    %131 = arith.cmpi slt, %130, %9 : vector<8x1xi32>
    %cst_37 = arith.constant 0.000000e+00 : f32
    %132 = vector.shape_cast %131 : vector<8x1xi1> to vector<8x1xi1>
    %133 = vector.broadcast %132 : vector<8x1xi1> to vector<8x128xi1>
    %134 = vector.broadcast %cst_37 : f32 to vector<8x128xf32>
    %135 = arith.select %133, %129, %134 : vector<8x128xi1>, vector<8x128xf32>
    %136 = arith.index_cast %c2_i32 : i32 to index
    %c0_38 = arith.constant 0 : index
    %c0_39 = arith.constant 0 : index
    %137 = vector.load %arg6[%136, %c0_38, %c0_39] : memref<8x8x128xf32, #tpu.memory_space<vmem>>, vector<1x8x128xf32>
    %138 = vector.shape_cast %137 : vector<1x8x128xf32> to vector<8x128xf32>
    %139 = vector.shape_cast %135 : vector<8x128xf32> to vector<1x8x128xf32>
    tpu.vector_store %arg6[%136, %c0_38, %c0_39], %139 {strides = array<i32>} : memref<8x8x128xf32, #tpu.memory_space<vmem>>, vector<1x8x128xf32>,
    %c3_i32 = arith.constant 3 : i32
    %c8_i32_40 = arith.constant 8 : i32
    %140 = arith.muli %c3_i32, %c8_i32_40 : i32
    %141 = tpu.assume_multiple %140, 8 : i32
    %142 = arith.index_cast %141 : i32 to index
    %c0_41 = arith.constant 0 : index
    %143 = vector.load %arg7[%142, %c0_41] : memref<64x384xf32, #tpu.memory_space<vmem>>, vector<8x384xf32>
    %cst_42 = arith.constant dense<0.000000e+00> : vector<8x384xf32>
    %144 = tpu.matmul %129, %7, %cst_42 {dimension_numbers = #tpu.dot_dimension_numbers<[1], [0], [0], [1], [0, 0, 1, 1], [], []>} : vector<8x128xf32>, vector<128x384xf32>, vector<8x384xf32> -> vector<8x384xf32>
    %145 = vector.broadcast %8 : vector<1x384xf32> to vector<8x384xf32>
    %146 = arith.addf %144, %145 : vector<8x384xf32>
    %147 = vector.extract_strided_slice %143 {offsets = [0, 0], sizes = [8, 128], strides = [1, 1]} : vector<8x384xf32> to vector<8x128xf32>
    %148 = vector.extract_strided_slice %146 {offsets = [0, 0], sizes = [8, 128], strides = [1, 1]} : vector<8x384xf32> to vector<8x128xf32>
    %149 = arith.addf %147, %148 : vector<8x128xf32>
    %150 = arith.negf %149 : vector<8x128xf32>
    %151 = math.exp %150 : vector<8x128xf32>
    %cst_43 = arith.constant 1.000000e+00 : f32
    %152 = vector.broadcast %cst_43 : f32 to vector<8x128xf32>
    %153 = arith.addf %152, %151 : vector<8x128xf32>
    %154 = arith.divf %152, %153 : vector<8x128xf32>
    %155 = vector.extract_strided_slice %143 {offsets = [0, 128], sizes = [8, 128], strides = [1, 1]} : vector<8x384xf32> to vector<8x128xf32>
    %156 = vector.extract_strided_slice %146 {offsets = [0, 128], sizes = [8, 128], strides = [1, 1]} : vector<8x384xf32> to vector<8x128xf32>
    %157 = arith.addf %155, %156 : vector<8x128xf32>
    %158 = arith.negf %157 : vector<8x128xf32>
    %159 = math.exp %158 : vector<8x128xf32>
    %cst_44 = arith.constant 1.000000e+00 : f32
    %160 = vector.broadcast %cst_44 : f32 to vector<8x128xf32>
    %161 = arith.addf %160, %159 : vector<8x128xf32>
    %162 = arith.divf %160, %161 : vector<8x128xf32>
    %163 = vector.extract_strided_slice %143 {offsets = [0, 256], sizes = [8, 128], strides = [1, 1]} : vector<8x384xf32> to vector<8x128xf32>
    %164 = vector.extract_strided_slice %146 {offsets = [0, 256], sizes = [8, 128], strides = [1, 1]} : vector<8x384xf32> to vector<8x128xf32>
    %165 = arith.mulf %154, %164 : vector<8x128xf32>
    %166 = arith.addf %163, %165 : vector<8x128xf32>
    %167 = math.tanh %166 : vector<8x128xf32>
    %cst_45 = arith.constant 1.000000e+00 : f32
    %168 = vector.broadcast %cst_45 : f32 to vector<8x128xf32>
    %169 = arith.subf %168, %162 : vector<8x128xf32>
    %170 = arith.mulf %169, %167 : vector<8x128xf32>
    %171 = arith.mulf %162, %129 : vector<8x128xf32>
    %172 = arith.addf %170, %171 : vector<8x128xf32>
    %173 = vector.broadcast %c3_i32 : i32 to vector<8x1xi32>
    %174 = arith.cmpi slt, %173, %9 : vector<8x1xi32>
    %cst_46 = arith.constant 0.000000e+00 : f32
    %175 = vector.shape_cast %174 : vector<8x1xi1> to vector<8x1xi1>
    %176 = vector.broadcast %175 : vector<8x1xi1> to vector<8x128xi1>
    %177 = vector.broadcast %cst_46 : f32 to vector<8x128xf32>
    %178 = arith.select %176, %172, %177 : vector<8x128xi1>, vector<8x128xf32>
    %179 = arith.index_cast %c3_i32 : i32 to index
    %c0_47 = arith.constant 0 : index
    %c0_48 = arith.constant 0 : index
    %180 = vector.load %arg6[%179, %c0_47, %c0_48] : memref<8x8x128xf32, #tpu.memory_space<vmem>>, vector<1x8x128xf32>
    %181 = vector.shape_cast %180 : vector<1x8x128xf32> to vector<8x128xf32>
    %182 = vector.shape_cast %178 : vector<8x128xf32> to vector<1x8x128xf32>
    tpu.vector_store %arg6[%179, %c0_47, %c0_48], %182 {strides = array<i32>} : memref<8x8x128xf32, #tpu.memory_space<vmem>>, vector<1x8x128xf32>,
    %c4_i32 = arith.constant 4 : i32
    %c8_i32_49 = arith.constant 8 : i32
    %183 = arith.muli %c4_i32, %c8_i32_49 : i32
    %184 = tpu.assume_multiple %183, 8 : i32
    %185 = arith.index_cast %184 : i32 to index
    %c0_50 = arith.constant 0 : index
    %186 = vector.load %arg7[%185, %c0_50] : memref<64x384xf32, #tpu.memory_space<vmem>>, vector<8x384xf32>
    %cst_51 = arith.constant dense<0.000000e+00> : vector<8x384xf32>
    %187 = tpu.matmul %172, %7, %cst_51 {dimension_numbers = #tpu.dot_dimension_numbers<[1], [0], [0], [1], [0, 0, 1, 1], [], []>} : vector<8x128xf32>, vector<128x384xf32>, vector<8x384xf32> -> vector<8x384xf32>
    %188 = vector.broadcast %8 : vector<1x384xf32> to vector<8x384xf32>
    %189 = arith.addf %187, %188 : vector<8x384xf32>
    %190 = vector.extract_strided_slice %186 {offsets = [0, 0], sizes = [8, 128], strides = [1, 1]} : vector<8x384xf32> to vector<8x128xf32>
    %191 = vector.extract_strided_slice %189 {offsets = [0, 0], sizes = [8, 128], strides = [1, 1]} : vector<8x384xf32> to vector<8x128xf32>
    %192 = arith.addf %190, %191 : vector<8x128xf32>
    %193 = arith.negf %192 : vector<8x128xf32>
    %194 = math.exp %193 : vector<8x128xf32>
    %cst_52 = arith.constant 1.000000e+00 : f32
    %195 = vector.broadcast %cst_52 : f32 to vector<8x128xf32>
    %196 = arith.addf %195, %194 : vector<8x128xf32>
    %197 = arith.divf %195, %196 : vector<8x128xf32>
    %198 = vector.extract_strided_slice %186 {offsets = [0, 128], sizes = [8, 128], strides = [1, 1]} : vector<8x384xf32> to vector<8x128xf32>
    %199 = vector.extract_strided_slice %189 {offsets = [0, 128], sizes = [8, 128], strides = [1, 1]} : vector<8x384xf32> to vector<8x128xf32>
    %200 = arith.addf %198, %199 : vector<8x128xf32>
    %201 = arith.negf %200 : vector<8x128xf32>
    %202 = math.exp %201 : vector<8x128xf32>
    %cst_53 = arith.constant 1.000000e+00 : f32
    %203 = vector.broadcast %cst_53 : f32 to vector<8x128xf32>
    %204 = arith.addf %203, %202 : vector<8x128xf32>
    %205 = arith.divf %203, %204 : vector<8x128xf32>
    %206 = vector.extract_strided_slice %186 {offsets = [0, 256], sizes = [8, 128], strides = [1, 1]} : vector<8x384xf32> to vector<8x128xf32>
    %207 = vector.extract_strided_slice %189 {offsets = [0, 256], sizes = [8, 128], strides = [1, 1]} : vector<8x384xf32> to vector<8x128xf32>
    %208 = arith.mulf %197, %207 : vector<8x128xf32>
    %209 = arith.addf %206, %208 : vector<8x128xf32>
    %210 = math.tanh %209 : vector<8x128xf32>
    %cst_54 = arith.constant 1.000000e+00 : f32
    %211 = vector.broadcast %cst_54 : f32 to vector<8x128xf32>
    %212 = arith.subf %211, %205 : vector<8x128xf32>
    %213 = arith.mulf %212, %210 : vector<8x128xf32>
    %214 = arith.mulf %205, %172 : vector<8x128xf32>
    %215 = arith.addf %213, %214 : vector<8x128xf32>
    %216 = vector.broadcast %c4_i32 : i32 to vector<8x1xi32>
    %217 = arith.cmpi slt, %216, %9 : vector<8x1xi32>
    %cst_55 = arith.constant 0.000000e+00 : f32
    %218 = vector.shape_cast %217 : vector<8x1xi1> to vector<8x1xi1>
    %219 = vector.broadcast %218 : vector<8x1xi1> to vector<8x128xi1>
    %220 = vector.broadcast %cst_55 : f32 to vector<8x128xf32>
    %221 = arith.select %219, %215, %220 : vector<8x128xi1>, vector<8x128xf32>
    %222 = arith.index_cast %c4_i32 : i32 to index
    %c0_56 = arith.constant 0 : index
    %c0_57 = arith.constant 0 : index
    %223 = vector.load %arg6[%222, %c0_56, %c0_57] : memref<8x8x128xf32, #tpu.memory_space<vmem>>, vector<1x8x128xf32>
    %224 = vector.shape_cast %223 : vector<1x8x128xf32> to vector<8x128xf32>
    %225 = vector.shape_cast %221 : vector<8x128xf32> to vector<1x8x128xf32>
    tpu.vector_store %arg6[%222, %c0_56, %c0_57], %225 {strides = array<i32>} : memref<8x8x128xf32, #tpu.memory_space<vmem>>, vector<1x8x128xf32>,
    %c5_i32 = arith.constant 5 : i32
    %c8_i32_58 = arith.constant 8 : i32
    %226 = arith.muli %c5_i32, %c8_i32_58 : i32
    %227 = tpu.assume_multiple %226, 8 : i32
    %228 = arith.index_cast %227 : i32 to index
    %c0_59 = arith.constant 0 : index
    %229 = vector.load %arg7[%228, %c0_59] : memref<64x384xf32, #tpu.memory_space<vmem>>, vector<8x384xf32>
    %cst_60 = arith.constant dense<0.000000e+00> : vector<8x384xf32>
    %230 = tpu.matmul %215, %7, %cst_60 {dimension_numbers = #tpu.dot_dimension_numbers<[1], [0], [0], [1], [0, 0, 1, 1], [], []>} : vector<8x128xf32>, vector<128x384xf32>, vector<8x384xf32> -> vector<8x384xf32>
    %231 = vector.broadcast %8 : vector<1x384xf32> to vector<8x384xf32>
    %232 = arith.addf %230, %231 : vector<8x384xf32>
    %233 = vector.extract_strided_slice %229 {offsets = [0, 0], sizes = [8, 128], strides = [1, 1]} : vector<8x384xf32> to vector<8x128xf32>
    %234 = vector.extract_strided_slice %232 {offsets = [0, 0], sizes = [8, 128], strides = [1, 1]} : vector<8x384xf32> to vector<8x128xf32>
    %235 = arith.addf %233, %234 : vector<8x128xf32>
    %236 = arith.negf %235 : vector<8x128xf32>
    %237 = math.exp %236 : vector<8x128xf32>
    %cst_61 = arith.constant 1.000000e+00 : f32
    %238 = vector.broadcast %cst_61 : f32 to vector<8x128xf32>
    %239 = arith.addf %238, %237 : vector<8x128xf32>
    %240 = arith.divf %238, %239 : vector<8x128xf32>
    %241 = vector.extract_strided_slice %229 {offsets = [0, 128], sizes = [8, 128], strides = [1, 1]} : vector<8x384xf32> to vector<8x128xf32>
    %242 = vector.extract_strided_slice %232 {offsets = [0, 128], sizes = [8, 128], strides = [1, 1]} : vector<8x384xf32> to vector<8x128xf32>
    %243 = arith.addf %241, %242 : vector<8x128xf32>
    %244 = arith.negf %243 : vector<8x128xf32>
    %245 = math.exp %244 : vector<8x128xf32>
    %cst_62 = arith.constant 1.000000e+00 : f32
    %246 = vector.broadcast %cst_62 : f32 to vector<8x128xf32>
    %247 = arith.addf %246, %245 : vector<8x128xf32>
    %248 = arith.divf %246, %247 : vector<8x128xf32>
    %249 = vector.extract_strided_slice %229 {offsets = [0, 256], sizes = [8, 128], strides = [1, 1]} : vector<8x384xf32> to vector<8x128xf32>
    %250 = vector.extract_strided_slice %232 {offsets = [0, 256], sizes = [8, 128], strides = [1, 1]} : vector<8x384xf32> to vector<8x128xf32>
    %251 = arith.mulf %240, %250 : vector<8x128xf32>
    %252 = arith.addf %249, %251 : vector<8x128xf32>
    %253 = math.tanh %252 : vector<8x128xf32>
    %cst_63 = arith.constant 1.000000e+00 : f32
    %254 = vector.broadcast %cst_63 : f32 to vector<8x128xf32>
    %255 = arith.subf %254, %248 : vector<8x128xf32>
    %256 = arith.mulf %255, %253 : vector<8x128xf32>
    %257 = arith.mulf %248, %215 : vector<8x128xf32>
    %258 = arith.addf %256, %257 : vector<8x128xf32>
    %259 = vector.broadcast %c5_i32 : i32 to vector<8x1xi32>
    %260 = arith.cmpi slt, %259, %9 : vector<8x1xi32>
    %cst_64 = arith.constant 0.000000e+00 : f32
    %261 = vector.shape_cast %260 : vector<8x1xi1> to vector<8x1xi1>
    %262 = vector.broadcast %261 : vector<8x1xi1> to vector<8x128xi1>
    %263 = vector.broadcast %cst_64 : f32 to vector<8x128xf32>
    %264 = arith.select %262, %258, %263 : vector<8x128xi1>, vector<8x128xf32>
    %265 = arith.index_cast %c5_i32 : i32 to index
    %c0_65 = arith.constant 0 : index
    %c0_66 = arith.constant 0 : index
    %266 = vector.load %arg6[%265, %c0_65, %c0_66] : memref<8x8x128xf32, #tpu.memory_space<vmem>>, vector<1x8x128xf32>
    %267 = vector.shape_cast %266 : vector<1x8x128xf32> to vector<8x128xf32>
    %268 = vector.shape_cast %264 : vector<8x128xf32> to vector<1x8x128xf32>
    tpu.vector_store %arg6[%265, %c0_65, %c0_66], %268 {strides = array<i32>} : memref<8x8x128xf32, #tpu.memory_space<vmem>>, vector<1x8x128xf32>,
    %c6_i32 = arith.constant 6 : i32
    %c8_i32_67 = arith.constant 8 : i32
    %269 = arith.muli %c6_i32, %c8_i32_67 : i32
    %270 = tpu.assume_multiple %269, 8 : i32
    %271 = arith.index_cast %270 : i32 to index
    %c0_68 = arith.constant 0 : index
    %272 = vector.load %arg7[%271, %c0_68] : memref<64x384xf32, #tpu.memory_space<vmem>>, vector<8x384xf32>
    %cst_69 = arith.constant dense<0.000000e+00> : vector<8x384xf32>
    %273 = tpu.matmul %258, %7, %cst_69 {dimension_numbers = #tpu.dot_dimension_numbers<[1], [0], [0], [1], [0, 0, 1, 1], [], []>} : vector<8x128xf32>, vector<128x384xf32>, vector<8x384xf32> -> vector<8x384xf32>
    %274 = vector.broadcast %8 : vector<1x384xf32> to vector<8x384xf32>
    %275 = arith.addf %273, %274 : vector<8x384xf32>
    %276 = vector.extract_strided_slice %272 {offsets = [0, 0], sizes = [8, 128], strides = [1, 1]} : vector<8x384xf32> to vector<8x128xf32>
    %277 = vector.extract_strided_slice %275 {offsets = [0, 0], sizes = [8, 128], strides = [1, 1]} : vector<8x384xf32> to vector<8x128xf32>
    %278 = arith.addf %276, %277 : vector<8x128xf32>
    %279 = arith.negf %278 : vector<8x128xf32>
    %280 = math.exp %279 : vector<8x128xf32>
    %cst_70 = arith.constant 1.000000e+00 : f32
    %281 = vector.broadcast %cst_70 : f32 to vector<8x128xf32>
    %282 = arith.addf %281, %280 : vector<8x128xf32>
    %283 = arith.divf %281, %282 : vector<8x128xf32>
    %284 = vector.extract_strided_slice %272 {offsets = [0, 128], sizes = [8, 128], strides = [1, 1]} : vector<8x384xf32> to vector<8x128xf32>
    %285 = vector.extract_strided_slice %275 {offsets = [0, 128], sizes = [8, 128], strides = [1, 1]} : vector<8x384xf32> to vector<8x128xf32>
    %286 = arith.addf %284, %285 : vector<8x128xf32>
    %287 = arith.negf %286 : vector<8x128xf32>
    %288 = math.exp %287 : vector<8x128xf32>
    %cst_71 = arith.constant 1.000000e+00 : f32
    %289 = vector.broadcast %cst_71 : f32 to vector<8x128xf32>
    %290 = arith.addf %289, %288 : vector<8x128xf32>
    %291 = arith.divf %289, %290 : vector<8x128xf32>
    %292 = vector.extract_strided_slice %272 {offsets = [0, 256], sizes = [8, 128], strides = [1, 1]} : vector<8x384xf32> to vector<8x128xf32>
    %293 = vector.extract_strided_slice %275 {offsets = [0, 256], sizes = [8, 128], strides = [1, 1]} : vector<8x384xf32> to vector<8x128xf32>
    %294 = arith.mulf %283, %293 : vector<8x128xf32>
    %295 = arith.addf %292, %294 : vector<8x128xf32>
    %296 = math.tanh %295 : vector<8x128xf32>
    %cst_72 = arith.constant 1.000000e+00 : f32
    %297 = vector.broadcast %cst_72 : f32 to vector<8x128xf32>
    %298 = arith.subf %297, %291 : vector<8x128xf32>
    %299 = arith.mulf %298, %296 : vector<8x128xf32>
    %300 = arith.mulf %291, %258 : vector<8x128xf32>
    %301 = arith.addf %299, %300 : vector<8x128xf32>
    %302 = vector.broadcast %c6_i32 : i32 to vector<8x1xi32>
    %303 = arith.cmpi slt, %302, %9 : vector<8x1xi32>
    %cst_73 = arith.constant 0.000000e+00 : f32
    %304 = vector.shape_cast %303 : vector<8x1xi1> to vector<8x1xi1>
    %305 = vector.broadcast %304 : vector<8x1xi1> to vector<8x128xi1>
    %306 = vector.broadcast %cst_73 : f32 to vector<8x128xf32>
    %307 = arith.select %305, %301, %306 : vector<8x128xi1>, vector<8x128xf32>
    %308 = arith.index_cast %c6_i32 : i32 to index
    %c0_74 = arith.constant 0 : index
    %c0_75 = arith.constant 0 : index
    %309 = vector.load %arg6[%308, %c0_74, %c0_75] : memref<8x8x128xf32, #tpu.memory_space<vmem>>, vector<1x8x128xf32>
    %310 = vector.shape_cast %309 : vector<1x8x128xf32> to vector<8x128xf32>
    %311 = vector.shape_cast %307 : vector<8x128xf32> to vector<1x8x128xf32>
    tpu.vector_store %arg6[%308, %c0_74, %c0_75], %311 {strides = array<i32>} : memref<8x8x128xf32, #tpu.memory_space<vmem>>, vector<1x8x128xf32>,
    %c7_i32 = arith.constant 7 : i32
    %c8_i32_76 = arith.constant 8 : i32
    %312 = arith.muli %c7_i32, %c8_i32_76 : i32
    %313 = tpu.assume_multiple %312, 8 : i32
    %314 = arith.index_cast %313 : i32 to index
    %c0_77 = arith.constant 0 : index
    %315 = vector.load %arg7[%314, %c0_77] : memref<64x384xf32, #tpu.memory_space<vmem>>, vector<8x384xf32>
    %cst_78 = arith.constant dense<0.000000e+00> : vector<8x384xf32>
    %316 = tpu.matmul %301, %7, %cst_78 {dimension_numbers = #tpu.dot_dimension_numbers<[1], [0], [0], [1], [0, 0, 1, 1], [], []>} : vector<8x128xf32>, vector<128x384xf32>, vector<8x384xf32> -> vector<8x384xf32>
    %317 = vector.broadcast %8 : vector<1x384xf32> to vector<8x384xf32>
    %318 = arith.addf %316, %317 : vector<8x384xf32>
    %319 = vector.extract_strided_slice %315 {offsets = [0, 0], sizes = [8, 128], strides = [1, 1]} : vector<8x384xf32> to vector<8x128xf32>
    %320 = vector.extract_strided_slice %318 {offsets = [0, 0], sizes = [8, 128], strides = [1, 1]} : vector<8x384xf32> to vector<8x128xf32>
    %321 = arith.addf %319, %320 : vector<8x128xf32>
    %322 = arith.negf %321 : vector<8x128xf32>
    %323 = math.exp %322 : vector<8x128xf32>
    %cst_79 = arith.constant 1.000000e+00 : f32
    %324 = vector.broadcast %cst_79 : f32 to vector<8x128xf32>
    %325 = arith.addf %324, %323 : vector<8x128xf32>
    %326 = arith.divf %324, %325 : vector<8x128xf32>
    %327 = vector.extract_strided_slice %315 {offsets = [0, 128], sizes = [8, 128], strides = [1, 1]} : vector<8x384xf32> to vector<8x128xf32>
    %328 = vector.extract_strided_slice %318 {offsets = [0, 128], sizes = [8, 128], strides = [1, 1]} : vector<8x384xf32> to vector<8x128xf32>
    %329 = arith.addf %327, %328 : vector<8x128xf32>
    %330 = arith.negf %329 : vector<8x128xf32>
    %331 = math.exp %330 : vector<8x128xf32>
    %cst_80 = arith.constant 1.000000e+00 : f32
    %332 = vector.broadcast %cst_80 : f32 to vector<8x128xf32>
    %333 = arith.addf %332, %331 : vector<8x128xf32>
    %334 = arith.divf %332, %333 : vector<8x128xf32>
    %335 = vector.extract_strided_slice %315 {offsets = [0, 256], sizes = [8, 128], strides = [1, 1]} : vector<8x384xf32> to vector<8x128xf32>
    %336 = vector.extract_strided_slice %318 {offsets = [0, 256], sizes = [8, 128], strides = [1, 1]} : vector<8x384xf32> to vector<8x128xf32>
    %337 = arith.mulf %326, %336 : vector<8x128xf32>
    %338 = arith.addf %335, %337 : vector<8x128xf32>
    %339 = math.tanh %338 : vector<8x128xf32>
    %cst_81 = arith.constant 1.000000e+00 : f32
    %340 = vector.broadcast %cst_81 : f32 to vector<8x128xf32>
    %341 = arith.subf %340, %334 : vector<8x128xf32>
    %342 = arith.mulf %341, %339 : vector<8x128xf32>
    %343 = arith.mulf %334, %301 : vector<8x128xf32>
    %344 = arith.addf %342, %343 : vector<8x128xf32>
    %345 = vector.broadcast %c7_i32 : i32 to vector<8x1xi32>
    %346 = arith.cmpi slt, %345, %9 : vector<8x1xi32>
    %cst_82 = arith.constant 0.000000e+00 : f32
    %347 = vector.shape_cast %346 : vector<8x1xi1> to vector<8x1xi1>
    %348 = vector.broadcast %347 : vector<8x1xi1> to vector<8x128xi1>
    %349 = vector.broadcast %cst_82 : f32 to vector<8x128xf32>
    %350 = arith.select %348, %344, %349 : vector<8x128xi1>, vector<8x128xf32>
    %351 = arith.index_cast %c7_i32 : i32 to index
    %c0_83 = arith.constant 0 : index
    %c0_84 = arith.constant 0 : index
    %352 = vector.load %arg6[%351, %c0_83, %c0_84] : memref<8x8x128xf32, #tpu.memory_space<vmem>>, vector<1x8x128xf32>
    %353 = vector.shape_cast %352 : vector<1x8x128xf32> to vector<8x128xf32>
    %354 = vector.shape_cast %350 : vector<8x128xf32> to vector<1x8x128xf32>
    tpu.vector_store %arg6[%351, %c0_83, %c0_84], %354 {strides = array<i32>} : memref<8x8x128xf32, #tpu.memory_space<vmem>>, vector<1x8x128xf32>,
    %c8_i32_85 = arith.constant 8 : i32
    return
  }
}

</mosaic_0001>

<bundles_post_ra>
// kernel: tpu_custom_call.1
= control target key start
LH: loop header
LB: loop body
LE: loop exit
PB: predicated region body
PF: predicated region fallthrough
CT: control target
= control target key end

     0   :  { %11 = vsyncpa [#allocation4], 0  ;;  %s3705_s0 = inlined_call_operand.vmem [shape: s32[8,1], index: 0, kind: input, shape index: {}]   ;;  %s3706_s1 = inlined_call_operand.hbm [shape: f32[64,128], index: 1, kind: input, shape index: {}]   ;;  %s3707_s2 = inlined_call_operand.hbm [shape: f32[128,384], index: 2, kind: input, shape index: {}]   ;;  %s3708_s3 = inlined_call_operand.hbm [shape: f32[128,384], index: 3, kind: input, shape index: {}]   ;;  %s3709_s4 = inlined_call_operand.vmem [shape: f32[1,384], index: 4, kind: input, shape index: {}]   ;;  %s3710_s5 = inlined_call_operand.vmem [shape: f32[1,384], index: 5, kind: input, shape index: {}]   ;;  %s3711_s6 = inlined_call_operand.hbm [shape: f32[8,8,128], index: 6, kind: output, shape index: {}]  }
   0x1   :  { %12 = vsyncpa [#allocation7], 0 }
   0x2   :  { %13 = vsyncpa [#allocation5], 0  ;;  %s3135_s21 = smov [#allocation6]   ;;  %s3041_s25 = scalar_lea.hbm %s3707_s2, 6144 }
   0x3   :  { %s33_s22 = sshll.u32 %s3135_s21, 4  ;;  %p3042_p0 = scmp.ne.s32.totalorder %s3707_s2, %s3041_s25  ;;  %s34_s22 = int_to_ptr.vmem [resolvable:$true] %s33_s22 }
   0x4   :  { %p3045_p1 = scmp.lt.u32.totalorder %s3041_s25, %s3707_s2 }
   0x6   :  { %p3047_p2 = pnand %p3045_p1, %p3042_p0 }
   0x8   :  { %3050 = shalt.err (!%p3047_p2)
}
   0x9   :  { %s3051_s30 = scalar_lea.vmem %s34_s22, 6144  ;;  %p3056_p4 = scmp.lt.s32.totalorder %s34_s22, %s34_s22 }
   0xa   :  { %p3052_p3 = scmp.ne.s32.totalorder %s34_s22, %s3051_s30  ;;  %p3057_p5 = scmp.lt.s32.totalorder %s3051_s30, %s3051_s30 }
   0xc   :  { %p3058_p6 = por %p3057_p5, %p3056_p4 }
   0xe   :  { %p3059_p7 = pnand %p3058_p6, %p3052_p3 }
  0x10   :  { %3062 = shalt.err (!%p3059_p7)
}
  0x11   :  { %s3136_s7 = smov 384   ;;  %s3137_s8 = smov 24  }
  0x12   :  { %39 = dma.hbm_to_vmem [thread:$0]  %s3707_s2, 6144, %s34_s22, [#allocation7], %s3136_s7, %s3136_s7, %s3137_s8  }
  0x13   :  { %s3138_s11 = smov [#allocation3]   ;;  %s3063_s15 = scalar_lea.hbm %s3706_s1, 1024 }
  0x14   :  { %s21_s12 = sshll.u32 %s3138_s11, 4  ;;  %p3064_p8 = scmp.ne.s32.totalorder %s3706_s1, %s3063_s15  ;;  %s22_s12 = int_to_ptr.vmem [resolvable:$true] %s21_s12 }
  0x15   :  { %p3067_p9 = scmp.lt.u32.totalorder %s3063_s15, %s3706_s1 }
  0x17   :  { %p3069_p10 = pnand %p3067_p9, %p3064_p8 }
  0x19   :  { %3072 = shalt.err (!%p3069_p10)
}
  0x1a   :  { %s3073_s20 = scalar_lea.vmem %s22_s12, 1024  ;;  %p3078_p12 = scmp.lt.s32.totalorder %s22_s12, %s22_s12 }
  0x1b   :  { %p3074_p11 = scmp.ne.s32.totalorder %s22_s12, %s3073_s20  ;;  %p3079_p13 = scmp.lt.s32.totalorder %s3073_s20, %s3073_s20 }
  0x1d   :  { %p3080_p0 = por %p3079_p13, %p3078_p12 }
  0x1f   :  { %p3081_p1 = pnand %p3080_p0, %p3074_p11 }
  0x21   :  { %3084 = shalt.err (!%p3081_p1)
}
  0x22   :  { %s3139_s2 = smov 128   ;;  %s3140_s21 = smov 8  }
  0x23   :  { %27 = dma.hbm_to_vmem [thread:$0]  %s3706_s1, 1024, %s22_s12, [#allocation4], %s3139_s2, %s3139_s2, %s3140_s21  }
  0x24   :  { %s3141_s24 = smov [#allocation8]   ;;  %s3085_s28 = scalar_lea.hbm %s3708_s3, 6144 }
  0x25   :  { %s45_s25 = sshll.u32 %s3141_s24, 4  ;;  %p3086_p2 = scmp.ne.s32.totalorder %s3708_s3, %s3085_s28  ;;  %s46_s25 = int_to_ptr.vmem [resolvable:$true] %s45_s25 }
  0x26   :  { %p3089_p3 = scmp.lt.u32.totalorder %s3085_s28, %s3708_s3 }
  0x28   :  { %p3091_p4 = pnand %p3089_p3, %p3086_p2 }
  0x2a   :  { %3094 = shalt.err (!%p3091_p4)
}
  0x2b   :  { %s3095_s11 = scalar_lea.vmem %s46_s25, 6144  ;;  %p3100_p6 = scmp.lt.s32.totalorder %s46_s25, %s46_s25 }
  0x2c   :  { %p3096_p5 = scmp.ne.s32.totalorder %s46_s25, %s3095_s11  ;;  %p3101_p7 = scmp.lt.s32.totalorder %s3095_s11, %s3095_s11 }
  0x2e   :  { %p3102_p8 = por %p3101_p7, %p3100_p6 }
  0x30   :  { %p3103_p9 = pnand %p3102_p8, %p3096_p5 }
  0x32   :  { %3106 = shalt.err (!%p3103_p9)
}
  0x33   :  { %51 = dma.hbm_to_vmem [thread:$0]  %s3708_s3, 6144, %s46_s25, [#allocation7], %s3136_s7, %s3136_s7, %s3137_s8  }
  0x34   :  { %3129 = dma.done.wait [#allocation4], 1024  }
  0x35   :  { %3130 = vsyncadd [#allocation4], 4294966272 }
  0x36   :  { %3131 = dma.done.wait [#allocation7], 12288  }
  0x37   :  { %3132 = vsyncadd [#allocation7], 4294955008  ;;  %v3142_v0 = vmov 0.0   ;;  %v3143_v1 = vmov 0   ;;  %v74_v2 = vld [vmem:[#allocation6 + $0x8] sm:$0xff]  ;;  %v77_v3 = vld [vmem:[#allocation6 + $0x20] sm:$0xff] }
  0x38   :  { %202 = vmatprep.mubr.f32.mxu0 %v3142_v0  ;;  %2958 = vset.pattern.permute.xlu0 %v3143_v1  ;;  %v73_v4 = vld [vmem:[#allocation6] sm:$0xff]  ;;  %v2386_v5 = vpack.c.bf16 %v77_v3, %v74_v2  ;;  %v76_v6 = vld [vmem:[#allocation6 + $0x18] sm:$0xff]  ;;  %v83_v8 = vld [vmem:[#allocation6 + $0x50] sm:$0xff]  ;;  %vm3145_vm1 = vmmov 0  }
  0x39   :  { %2959 = vset.pattern.permute.xlu1 %v3143_v1  ;;  %v80_v7 = vld [vmem:[#allocation6 + $0x38] sm:$0xff]  ;;  %v2388_v9 = vpack.c.bf16 %v76_v6, %v73_v4  ;;  %v79_v11 = vld [vmem:[#allocation6 + $0x30] sm:$0xff]  ;;  %v82_v12 = vld [vmem:[#allocation6 + $0x48] sm:$0xff] }
  0x3a   :  { %v2390_v10 = vpack.c.bf16 %v83_v8, %v80_v7  ;;  %v86_v13 = vld [vmem:[#allocation6 + $0x68] sm:$0xff]  ;;  %2387 = vmatprep.subr.bf16.mxu0 %v2386_v5  ;;  %v89_v14 = vld [vmem:[#allocation6 + $0x80] sm:$0xff]  ;;  %v2392_v15 = vpack.c.bf16 %v82_v12, %v79_v11  ;;  %v88_v18 = vld [vmem:[#allocation6 + $0x78] sm:$0xff] }
  0x3b   :  { %2389 = vmatpush1.bf16.msra.mxu0 %v2388_v9  ;;  %v2394_v16 = vpack.c.bf16 %v89_v14, %v86_v13  ;;  %v85_v17 = vld [vmem:[#allocation6 + $0x60] sm:$0xff]  ;;  %v92_v19 = vld [vmem:[#allocation6 + $0x98] sm:$0xff]  ;;  %v95_v20 = vld [vmem:[#allocation6 + $0xb0] sm:$0xff] }
  0x3c   :  { %2391 = vmatprep.subr.bf16.mxu0 %v2390_v10  ;;  %v2396_v21 = vpack.c.bf16 %v88_v18, %v85_v17  ;;  %v91_v22 = vld [vmem:[#allocation6 + $0x90] sm:$0xff]  ;;  %v2398_v23 = vpack.c.bf16 %v95_v20, %v92_v19  ;;  %v94_v24 = vld [vmem:[#allocation6 + $0xa8] sm:$0xff]  ;;  %v101_v28 = vld [vmem:[#allocation6 + $0xe0] sm:$0xff] }
  0x3d   :  { %v75_v25 = vld [vmem:[#allocation6 + $0x10] sm:$0xff]  ;;  %v78_v26 = vld [vmem:[#allocation6 + $0x28] sm:$0xff]  ;;  %v81_v30 = vld [vmem:[#allocation6 + $0x40] sm:$0xff]  ;;  %v2400_v32 = vpack.c.bf16 %v94_v24, %v91_v22 }
  0x3e   :  { %v98_v27 = vld [vmem:[#allocation6 + $0xc8] sm:$0xff]  ;;  %v2418_v29 = vpack.c.bf16 %v78_v26, %v75_v25  ;;  %v84_v31 = vld [vmem:[#allocation6 + $0x58] sm:$0xff]  ;;  %v97_v33 = vld [vmem:[#allocation6 + $0xc0] sm:$0xff] }
  0x3f   :  { %2393 = vmatpush1.bf16.msra.mxu0 %v2392_v15  ;;  %v2422_v34 = vpack.c.bf16 %v84_v31, %v81_v30  ;;  %v2402_v35 = vpack.c.bf16 %v101_v28, %v98_v27  ;;  %v100_v36 = vld [vmem:[#allocation6 + $0xd8] sm:$0xff]  ;;  %v3230_v37 = vld [vmem:[#allocation3] sm:$0xff]  ;;  %v87_v38 = vld [vmem:[#allocation6 + $0x70] sm:$0xff] }
  0x40   :  { %2395 = vmatprep.subr.bf16.mxu0 %v2394_v16  ;;  %2419 = vmatprep.subr.bf16.mxu1 %v2418_v29  ;;  %v104_v39 = vld [vmem:[#allocation6 + $0xf8] sm:$0xff]  ;;  %v107_v40 = vld [vmem:[#allocation6 + $0x110] sm:$0xff]  ;;  %v90_v41 = vld [vmem:[#allocation6 + $0x88] sm:$0xff]  ;;  %v2404_v43 = vpack.c.bf16 %v100_v36, %v97_v33 }
  0x41   :  { %2421 = vmatpush3.bf16.msra.mxu1 %v2418_v29  ;;  %2094 = vmatprep.mubr.f32.mxu1 %v3230_v37  ;;  %v2426_v42 = vpack.c.bf16 %v90_v41, %v87_v38  ;;  %v93_v44 = vld [vmem:[#allocation6 + $0xa0] sm:$0xff]  ;;  %v96_v45 = vld [vmem:[#allocation6 + $0xb8] sm:$0xff]  ;;  %v2406_v46 = vpack.c.bf16 %v107_v40, %v104_v39  ;;  %v103_v47 = vld [vmem:[#allocation6 + $0xf0] sm:$0xff] }
  0x42   :  { %2423 = vmatprep.subr.bf16.mxu1 %v2422_v34  ;;  %v106_v48 = vld [vmem:[#allocation6 + $0x108] sm:$0xff]  ;;  %v113_v50 = vld [vmem:[#allocation6 + $0x140] sm:$0xff]  ;;  %v2430_v51 = vpack.c.bf16 %v96_v45, %v93_v44  ;;  %v99_v52 = vld [vmem:[#allocation6 + $0xd0] sm:$0xff]  ;;  %v3144_v44 = vmov 0.0|0.0  }
  0x43   :  { %2397 = vmatpush1.bf16.msra.mxu0 %v2396_v21  ;;  %v110_v49 = vld [vmem:[#allocation6 + $0x128] sm:$0xff]  ;;  %v2408_v54 = vpack.c.bf16 %v106_v48, %v103_v47  ;;  %v109_v56 = vld [vmem:[#allocation6 + $0x120] sm:$0xff]  ;;  %v112_v57 = vld [vmem:[#allocation6 + $0x138] sm:$0xff] }
  0x44   :  { %2399 = vmatprep.subr.bf16.mxu0 %v2398_v23  ;;  %v102_v53 = vld [vmem:[#allocation6 + $0xe8] sm:$0xff]  ;;  %v2410_v55 = vpack.c.bf16 %v113_v50, %v110_v49  ;;  %v116_v58 = vld [vmem:[#allocation6 + $0x158] sm:$0xff]  ;;  %v119_v59 = vld [vmem:[#allocation6 + $0x170] sm:$0xff]  ;;  %v2412_v63 = vpack.c.bf16 %v112_v57, %v109_v56 }
  0x45   :  { %2425 = vmatpush3.bf16.msra.mxu1 %v2422_v34  ;;  %v2434_v60 = vpack.c.bf16 %v102_v53, %v99_v52  ;;  %v105_v61 = vld [vmem:[#allocation6 + $0x100] sm:$0xff]  ;;  %v108_v62 = vld [vmem:[#allocation6 + $0x118] sm:$0xff]  ;;  %v2414_v2 = vpack.c.bf16 %v119_v59, %v116_v58  ;;  %v115_v3 = vld [vmem:[#allocation6 + $0x150] sm:$0xff] }
  0x46   :  { %2427 = vmatprep.subr.bf16.mxu1 %v2426_v42  ;;  %v118_v4 = vld [vmem:[#allocation6 + $0x168] sm:$0xff]  ;;  %v384_v6 = vld [vmem:[#allocation8 + $0x20] sm:$0xff]  ;;  %v2438_v7 = vpack.c.bf16 %v108_v62, %v105_v61  ;;  %v111_v8 = vld [vmem:[#allocation6 + $0x130] sm:$0xff] }
  0x47   :  { %2401 = vmatpush1.bf16.msra.mxu0 %v2400_v32  ;;  %v381_v5 = vld [vmem:[#allocation8 + $0x8] sm:$0xff]  ;;  %v2416_v10 = vpack.c.bf16 %v118_v4, %v115_v3  ;;  %v380_v12 = vld [vmem:[#allocation8] sm:$0xff]  ;;  %v383_v13 = vld [vmem:[#allocation8 + $0x18] sm:$0xff] }
  0x48   :  { %2403 = vmatprep.subr.bf16.mxu0 %v2402_v35  ;;  %v114_v9 = vld [vmem:[#allocation6 + $0x148] sm:$0xff]  ;;  %v3233_v11 = vpack.c.bf16 %v384_v6, %v381_v5  ;;  %v387_v14 = vld [vmem:[#allocation8 + $0x38] sm:$0xff]  ;;  %v390_v15 = vld [vmem:[#allocation8 + $0x50] sm:$0xff]  ;;  %v3235_v19 = vpack.c.bf16 %v383_v13, %v380_v12 }
  0x49   :  { %2429 = vmatpush3.bf16.msra.mxu1 %v2426_v42  ;;  %v2442_v16 = vpack.c.bf16 %v114_v9, %v111_v8  ;;  %v117_v17 = vld [vmem:[#allocation6 + $0x160] sm:$0xff]  ;;  %v120_v18 = vld [vmem:[#allocation6 + $0x178] sm:$0xff]  ;;  %v3238_v20 = vpack.c.bf16 %v390_v15, %v387_v14  ;;  %v386_v21 = vld [vmem:[#allocation8 + $0x30] sm:$0xff] }
  0x4a   :  { %2431 = vmatprep.subr.bf16.mxu1 %v2430_v51  ;;  %v389_v22 = vld [vmem:[#allocation8 + $0x48] sm:$0xff]  ;;  %v396_v24 = vld [vmem:[#allocation8 + $0x80] sm:$0xff]  ;;  %v2446_v25 = vpack.c.bf16 %v120_v18, %v117_v17  ;;  %v395_v32 = vld [vmem:[#allocation8 + $0x78] sm:$0xff] }
  0x4b   :  { %2405 = vmatpush1.bf16.msra.mxu0 %v2404_v43  ;;  %v393_v23 = vld [vmem:[#allocation8 + $0x68] sm:$0xff]  ;;  %v3243_v26 = vld [vmem:[%s3705_s0] sm:$0xff]  ;;  %v3249_v28 = vpack.c.bf16 %v389_v22, %v386_v21  ;;  %v399_v33 = vld [vmem:[#allocation8 + $0x98] sm:$0xff] }
  0x4c   :  { %2407 = vmatprep.subr.bf16.mxu0 %v2406_v46  ;;  %vm614_vm0 = vcmp.gt.s32.totalorder %v3243_v26, 0  ;;  %v66_v27 = vld [vmem:[#allocation3 + $0x8] sm:$0xff]  ;;  %v3253_v30 = vpack.c.bf16 %v396_v24, %v393_v23  ;;  %v392_v31 = vld [vmem:[#allocation8 + $0x60] sm:$0xff]  ;;  %v402_v34 = vld [vmem:[#allocation8 + $0xb0] sm:$0xff]  ;;  %vm790_vm2 = vcmp.gt.s32.totalorder %v3243_v26, 1  ;;  %vm967_vm4 = vcmp.gt.s32.totalorder %v3243_v26, 2 }
  0x4d   :  { %2433 = vmatpush3.bf16.msra.mxu1 %v2430_v51  ;;  %v615_v29 = vsel %vm614_vm0, 1, %v3143_v1  ;;  %v382_v35 = vld [vmem:[#allocation8 + $0x10] sm:$0xff]  ;;  %v385_v36 = vld [vmem:[#allocation8 + $0x28] sm:$0xff]  ;;  %v3257_v38 = vpack.c.bf16 %v395_v32, %v392_v31  ;;  %v3260_v39 = vpack.c.bf16 %v402_v34, %v399_v33  ;;  %v408_v43 = vld [vmem:[#allocation8 + $0xe0] sm:$0xff]  ;;  %vm1144_vm6 = vcmp.gt.s32.totalorder %v3243_v26, 3 }
  0x4e   :  { %2435 = vmatprep.subr.bf16.mxu1 %v2434_v60  ;;  %617 = vperm.xlu0 %2958, %v615_v29   ;;  %v398_v40 = vld [vmem:[#allocation8 + $0x90] sm:$0xff]  ;;  %v401_v41 = vld [vmem:[#allocation8 + $0xa8] sm:$0xff]  ;;  %v3263_v45 = vpack.c.bf16 %v385_v36, %v382_v35  ;;  %v388_v46 = vld [vmem:[#allocation8 + $0x40] sm:$0xff]  ;;  %vm1321_vm8 = vcmp.gt.s32.totalorder %v3243_v26, 4  ;;  %vm1498_vm10 = vcmp.gt.s32.totalorder %v3243_v26, 5 }
  0x4f   :  { %2409 = vmatpush1.bf16.msra.mxu0 %v2408_v54  ;;  %v405_v42 = vld [vmem:[#allocation8 + $0xc8] sm:$0xff]  ;;  %v391_v47 = vld [vmem:[#allocation8 + $0x58] sm:$0xff]  ;;  %v3267_v49 = vpack.c.bf16 %v401_v41, %v398_v40  ;;  %v404_v51 = vld [vmem:[#allocation8 + $0xc0] sm:$0xff]  ;;  %v791_v41 = vsel %vm790_vm2, 1, %v3143_v1 }
  0x50   :  { %2411 = vmatprep.subr.bf16.mxu0 %v2410_v55  ;;  %v68_v48 = vld [vmem:[#allocation3 + $0x18] sm:$0xff]  ;;  %v3270_v50 = vpack.c.bf16 %v408_v43, %v405_v42  ;;  %v414_v54 = vld [vmem:[#allocation8 + $0x110] sm:$0xff]  ;;  %v3273_v55 = vpack.c.bf16 %v391_v47, %v388_v46  ;;  %v397_v57 = vld [vmem:[#allocation8 + $0x88] sm:$0xff]  ;;  %v123_v42 = vlaneseq }
  0x51   :  { %2437 = vmatpush3.bf16.msra.mxu1 %v2434_v60  ;;  %v407_v52 = vld [vmem:[#allocation8 + $0xd8] sm:$0xff]  ;;  %v394_v56 = vld [vmem:[#allocation8 + $0x70] sm:$0xff]  ;;  %v69_v58 = vld [vmem:[#allocation3 + $0x20] sm:$0xff] }
  0x52   :  { %2439 = vmatprep.subr.bf16.mxu1 %v2438_v7  ;;  %v411_v53 = vld [vmem:[#allocation8 + $0xf8] sm:$0xff]  ;;  %v3278_v59 = vpack.c.bf16 %v407_v52, %v404_v51  ;;  %v410_v61 = vld [vmem:[#allocation8 + $0xf0] sm:$0xff]  ;;  %v413_v62 = vld [vmem:[#allocation8 + $0x108] sm:$0xff]  ;;  %v3284_v3 = vpack.c.bf16 %v397_v57, %v394_v56  ;;  %793 = vperm.xlu0 %2958, %v791_v41   ;;  %v124_v43 = vshrl.u32 %v123_v42, 7 }
  0x53   :  { %2413 = vmatpush1.bf16.msra.mxu0 %v2412_v63  ;;  %v3281_v60 = vpack.c.bf16 %v414_v54, %v411_v53  ;;  %v417_v63 = vld [vmem:[#allocation8 + $0x128] sm:$0xff]  ;;  %v400_v4 = vld [vmem:[#allocation8 + $0xa0] sm:$0xff]  ;;  %v403_v5 = vld [vmem:[#allocation8 + $0xb8] sm:$0xff] }
  0x54   :  { %2415 = vmatprep.subr.bf16.mxu0 %v2414_v2  ;;  %v420_v2 = vld [vmem:[#allocation8 + $0x140] sm:$0xff]  ;;  %v70_v6 = vld [vmem:[#allocation3 + $0x28] sm:$0xff]  ;;  %v71_v8 = vld [vmem:[#allocation3 + $0x30] sm:$0xff]  ;;  %v3295_v15 = vpack.c.bf16 %v403_v5, %v400_v4  ;;  %v133_v46 = vsub.s32 2, %v124_v43  ;;  %v125_v4 = vsub.s32 0, %v124_v43 }
  0x55   :  { %2441 = vmatpush3.bf16.msra.mxu1 %v2438_v7  ;;  %v3289_v7 = vpack.c.bf16 %v413_v62, %v410_v61  ;;  %v3292_v9 = vpack.c.bf16 %v420_v2, %v417_v63  ;;  %v419_v12 = vld [vmem:[#allocation8 + $0x138] sm:$0xff]  ;;  %v426_v14 = vld [vmem:[#allocation8 + $0x170] sm:$0xff]  ;;  %v409_v17 = vld [vmem:[#allocation8 + $0xe8] sm:$0xff] }
  0x56   :  { %2443 = vmatprep.subr.bf16.mxu1 %v2442_v16  ;;  %v423_v13 = vld [vmem:[#allocation8 + $0x158] sm:$0xff]  ;;  %v422_v23 = vld [vmem:[#allocation8 + $0x150] sm:$0xff]  ;;  %v425_v24 = vld [vmem:[#allocation8 + $0x168] sm:$0xff] }
  0x57   :  { %2417 = vmatpush1.bf16.msra.mxu0 %v2416_v10  ;;  %v416_v10 = vld [vmem:[#allocation8 + $0x120] sm:$0xff]  ;;  %v72_v21 = vld [vmem:[#allocation3 + $0x38] sm:$0xff]  ;;  %v3303_v22 = vpack.c.bf16 %v426_v14, %v423_v13  ;;  %v3313_v31 = vpack.c.bf16 %v425_v24, %v422_v23  ;;  %v418_v33 = vld [vmem:[#allocation8 + $0x130] sm:$0xff] }
  0x58   :  { %2451 = vmatprep.subr.bf16.mxu0 %v3233_v11  ;;  %v3300_v18 = vpack.c.bf16 %v419_v12, %v416_v10  ;;  %v415_v29 = vld [vmem:[#allocation8 + $0x118] sm:$0xff]  ;;  %v421_v34 = vld [vmem:[#allocation8 + $0x148] sm:$0xff]  ;;  %v424_v36 = vld [vmem:[#allocation8 + $0x160] sm:$0xff]  ;;  %v129_v12 = vsub.s32 1, %v124_v43 }
  0x59   :  { %2445 = vmatpush3.bf16.msra.mxu1 %v2442_v16  ;;  %v406_v16 = vld [vmem:[#allocation8 + $0xd0] sm:$0xff]  ;;  %v3324_v35 = vpack.c.bf16 %v421_v34, %v418_v33  ;;  %v121_v47 = vld [vmem:[%s3709_s4] sm:$0x7] }
  0x5a   :  { %203 = vmatmul.mubr.f32.vlgmr.msra.gmra.mrb[0].mxu0 %v3230_v37  ;;  %2447 = vmatprep.subr.bf16.mxu1 %v2446_v25  ;;  %v67_v37 = vld [vmem:[#allocation3 + $0x10] sm:$0xff]  ;;  %v428_v5 = vld [vmem:[%s3710_s5] sm:$0x7]  ;;  %v126_v14 = vrot.slane %v121_v47, %v125_v4 }
  0x5b   :  { %2453 = vmatpush1.bf16.msra.mxu0 %v3235_v19  ;;  %208 = vmatprep.mubr.f32.mxu0 %v3142_v0 }
  0x5c   :  { %2455 = vmatprep.subr.bf16.mxu0 %v3238_v20 }
  0x5d   :  { %2449 = vmatpush3.bf16.msra.mxu1 %v2446_v25  ;;  %v3306_v25 = vpack.c.bf16 %v409_v17, %v406_v16  ;;  %v440_v16 = vrot.slane %v428_v5, %v125_v4  ;;  %v130_v17 = vrot.slane %v121_v47, %v129_v12 }
  0x5e   :  { %209 = vmatmul.mubr.f32.gmra.mrb[2].mxu0 %v66_v27  ;;  %2482 = vmatprep.subr.bf16.mxu1 %v3144_v44 }
  0x5f   :  { %2457 = vmatpush1.bf16.msra.mxu0 %v3249_v28  ;;  %214 = vmatprep.mubr.f32.mxu0 %v3142_v0  ;;  %v3392_v23 = vadd.f32 %v440_v16, %v126_v14 }
  0x60   :  { %2459 = vmatprep.subr.bf16.mxu0 %v3253_v30  ;;  %2095 = vmatmul.mubr.f32.vlgmr.msra.gmra.mrb[0].mxu1 %v66_v27  ;;  %v412_v27 = vld [vmem:[#allocation8 + $0x100] sm:$0xff] }
  0x61   :  { %2484 = vmatpush3.bf16.msra.mxu1 %v3263_v45  ;;  %2097 = vmatprep.mubr.f32.mxu1 %v67_v37  ;;  %v3317_v32 = vpack.c.bf16 %v415_v29, %v412_v27 }
  0x62   :  { %215 = vmatmul.mubr.f32.gmra.mrb[4].mxu0 %v67_v37  ;;  %2485 = vmatprep.subr.bf16.mxu1 %v3144_v44  ;;  %v427_v37 = vld [vmem:[#allocation8 + $0x178] sm:$0xff] }
  0x63   :  { %2461 = vmatpush1.bf16.msra.mxu0 %v3257_v38  ;;  %220 = vmatprep.mubr.f32.mxu0 %v3142_v0  ;;  %v3332_v40 = vpack.c.bf16 %v427_v37, %v424_v36 }
  0x64   :  { %2463 = vmatprep.subr.bf16.mxu0 %v3260_v39  ;;  %2098 = vmatmul.mubr.f32.gmra.mrb[2].mxu1 %v68_v48 }
  0x65   :  { %2487 = vmatpush3.bf16.msra.mxu1 %v3273_v55  ;;  %2100 = vmatprep.mubr.f32.mxu1 %v69_v58 }
  0x66   :  { %221 = vmatmul.mubr.f32.gmra.mrb[6].mxu0 %v68_v48  ;;  %2488 = vmatprep.subr.bf16.mxu1 %v3144_v44  ;;  %v134_v48 = vrot.slane %v121_v47, %v133_v46  ;;  %v3398_v47 = vrot.slane %v428_v5, %v133_v46 }
  0x67   :  { %2465 = vmatpush1.bf16.msra.mxu0 %v3267_v49  ;;  %226 = vmatprep.mubr.f32.mxu0 %v3142_v0 }
  0x68   :  { %2467 = vmatprep.subr.bf16.mxu0 %v3270_v50  ;;  %2101 = vmatmul.mubr.f32.gmra.mrb[4].mxu1 %v70_v6 }
  0x69   :  { %2490 = vmatpush3.bf16.msra.mxu1 %v3284_v3  ;;  %2103 = vmatprep.mubr.f32.mxu1 %v71_v8 }
  0x6a   :  { %227 = vmatmul.mubr.f32.gmra.mrb[8].mxu0 %v69_v58  ;;  %2491 = vmatprep.subr.bf16.mxu1 %v3144_v44 }
  0x6b   :  { %2469 = vmatpush1.bf16.msra.mxu0 %v3278_v59  ;;  %232 = vmatprep.mubr.f32.mxu0 %v3142_v0 }
  0x6c   :  { %2471 = vmatprep.subr.bf16.mxu0 %v3281_v60  ;;  %2104 = vmatmul.mubr.f32.gmra.mrb[6].mxu1 %v72_v21 }
  0x6d   :  { %2493 = vmatpush3.bf16.msra.mxu1 %v3295_v15  ;;  %2138 = vmatprep.mubr.msk.f32.mxu1 %vm3145_vm1, %v3142_v0 }
  0x6e   :  { %233 = vmatmul.mubr.f32.gmra.mrb[10].mxu0 %v70_v6  ;;  %2494 = vmatprep.subr.bf16.mxu1 %v3144_v44 }
  0x6f   :  { %2473 = vmatpush1.bf16.msra.mxu0 %v3289_v7  ;;  %238 = vmatprep.mubr.f32.mxu0 %v3142_v0 }
  0x70   :  { %2475 = vmatprep.subr.bf16.mxu0 %v3292_v9 }
  0x71   :  { %2496 = vmatpush3.bf16.msra.mxu1 %v3306_v25 }
  0x72   :  { %239 = vmatmul.mubr.f32.gmra.mrb[12].mxu0 %v71_v8  ;;  %2497 = vmatprep.subr.bf16.mxu1 %v3144_v44 }
  0x73   :  { %2477 = vmatpush1.bf16.msra.mxu0 %v3300_v18  ;;  %244 = vmatprep.mubr.f32.mxu0 %v3142_v0 }
  0x74   :  { %2479 = vmatprep.subr.bf16.mxu0 %v3303_v22 }
  0x75   :  { %2499 = vmatpush3.bf16.msra.mxu1 %v3317_v32 }
  0x76   :  { %245 = vmatmul.mubr.f32.gmra.mrb[14].mxu0 %v72_v21  ;;  %2500 = vmatprep.subr.bf16.mxu1 %v3144_v44  ;;  %v444_v21 = vrot.slane %v428_v5, %v129_v12 }
  0x77   :  { %2481 = vmatpush1.bf16.msra.mxu0 %v3313_v31  ;;  %516 = vmatprep.mubr.f32.mxu0 %v3142_v0 }
  0x78   :  { %2507 = vmatprep.subr.bf16.mxu0 %v3233_v11  ;;  %v3394_v27 = vadd.f32 %v444_v21, %v130_v17 }
  0x79   :  { %2502 = vmatpush3.bf16.msra.mxu1 %v3324_v35 }
  0x7a   :  { %517 = vmatmul.mubr.f32.vlgmr.msra.gmra.mrb[0].mxu0 %v3142_v0  ;;  %2503 = vmatprep.subr.bf16.mxu1 %v3144_v44 }
  0x7b   :  { %2509 = vmatpush1.bf16.msra.mxu0 %v3235_v19  ;;  %692 = vmatprep.mubr.f32.mxu0 %v3142_v0 }
  0x7c   :  { %2511 = vmatprep.subr.bf16.mxu0 %v3238_v20 }
  0x7d   :  { %2505 = vmatpush3.bf16.msra.mxu1 %v3332_v40 }
  0x7e   :  { %2538 = vmatprep.subr.bf16.mxu1 %v3144_v44 }
  0x7f   :  { %2513 = vmatpush1.bf16.msra.mxu0 %v3249_v28 }
  0x80   :  { %2515 = vmatprep.subr.bf16.mxu0 %v3253_v30  ;;  %2139 = vmatmul.mubr.f32.vlgmr.msra.gmra.mrb[8].mxu1 %v3142_v0 }
  0x81   :  { %2540 = vmatpush3.bf16.msra.mxu1 %v3263_v45  ;;  %2173 = vmatprep.mubr.msk.f32.mxu1 %vm3145_vm1, %v3142_v0 }
  0x82   :  { %2541 = vmatprep.subr.bf16.mxu1 %v3144_v44 }
  0x83   :  { %2517 = vmatpush1.bf16.msra.mxu0 %v3257_v38 }
  0x84   :  { %2519 = vmatprep.subr.bf16.mxu0 %v3260_v39 }
  0x85   :  { %2543 = vmatpush3.bf16.msra.mxu1 %v3273_v55 }
  0x86   :  { %2544 = vmatprep.subr.bf16.mxu1 %v3144_v44 }
  0x87   :  { %2521 = vmatpush1.bf16.msra.mxu0 %v3267_v49 }
  0x88   :  { %2523 = vmatprep.subr.bf16.mxu0 %v3270_v50 }
  0x89   :  { %2546 = vmatpush3.bf16.msra.mxu1 %v3284_v3 }
  0x8a   :  { %2547 = vmatprep.subr.bf16.mxu1 %v3144_v44 }
  0x8b   :  { %2525 = vmatpush1.bf16.msra.mxu0 %v3278_v59 }
  0x8c   :  { %2527 = vmatprep.subr.bf16.mxu0 %v3281_v60 }
  0x8d   :  { %2549 = vmatpush3.bf16.msra.mxu1 %v3295_v15 }
  0x8e   :  { %2550 = vmatprep.subr.bf16.mxu1 %v3144_v44 }
  0x8f   :  { %2529 = vmatpush1.bf16.msra.mxu0 %v3289_v7 }
  0x90   :  { %2531 = vmatprep.subr.bf16.mxu0 %v3292_v9 }
  0x91   :  { %2552 = vmatpush3.bf16.msra.mxu1 %v3306_v25 }
  0x92   :  { %2553 = vmatprep.subr.bf16.mxu1 %v3144_v44 }
  0x93   :  { %2533 = vmatpush1.bf16.msra.mxu0 %v3300_v18 }
  0x94   :  { %2535 = vmatprep.subr.bf16.mxu0 %v3303_v22 }
  0x95   :  { %2555 = vmatpush3.bf16.msra.mxu1 %v3317_v32 }
  0x96   :  { %2556 = vmatprep.subr.bf16.mxu1 %v3144_v44 }
  0x97   :  { %2537 = vmatpush1.bf16.msra.mxu0 %v3313_v31 }
  0x98   :  { %2563 = vmatprep.subr.bf16.mxu0 %v3233_v11 }
  0x99   :  { %2558 = vmatpush3.bf16.msra.mxu1 %v3324_v35 }
  0x9a   :  { %2559 = vmatprep.subr.bf16.mxu1 %v3144_v44 }
  0x9d   :  { %2561 = vmatpush3.bf16.msra.mxu1 %v3332_v40 }
  0x9e   :  { %2594 = vmatprep.subr.bf16.mxu1 %v3144_v44 }
  0xcd   :  { %v618_v14 = vpop.permute.xlu0 %617 }
  0xce   :  { %vm619_vm3 = vcmp.eq.s32.totalorder %v618_v14, 1 }
 0x133   :  { %v2096_v51 = vpop.f32.mrb[0].mxu1 }
 0x134   :  { %v3375_v52 = vadd.f32 %v2096_v51, %v134_v48  ;;  %v317_v53 = vpop.f32.mrb[1].mxu1 }
 0x135   :  { %v318_v4 = vadd.f32 %v317_v53, %v134_v48 }
 0x137   :  { %v2099_v54 = vpop.f32.mrb[2].mxu1 }
 0x138   :  { %v3377_v56 = vadd.f32 %v2099_v54, %v134_v48  ;;  %v327_v57 = vpop.f32.mrb[3].mxu1 }
 0x139   :  { %v3379_v58 = vadd.f32 %v327_v57, %v134_v48 }
 0x13b   :  { %v2102_v61 = vpop.f32.mrb[4].mxu1 }
 0x13c   :  { %v3381_v62 = vadd.f32 %v2102_v61, %v134_v48  ;;  %v337_v63 = vpop.f32.mrb[5].mxu1 }
 0x13d   :  { %v3383_v2 = vadd.f32 %v337_v63, %v134_v48 }
 0x13f   :  { %v2105_v6 = vpop.f32.mrb[6].mxu1 }
 0x140   :  { %v3388_v8 = vadd.f32 %v2105_v6, %v134_v48  ;;  %v347_v10 = vpop.f32.mrb[7].mxu1 }
 0x141   :  { %v3390_v13 = vadd.f32 %v347_v10, %v134_v48  ;;  %v968_v48 = vsel %vm967_vm4, 1, %v3143_v1 }
 0x142   :  { %970 = vperm.xlu1 %2959, %v968_v48  }
 0x14d   :  { %v518_v24 = vpop.f32.mrb[0].mxu0 }
 0x14e   :  { %v2899_v29 = vadd.f32 %v3392_v23, %v518_v24  ;;  %v520_v33 = vpop.f32.mrb[1].mxu0 }
 0x14f   :  { %v2901_v36 = vadd.f32 %v3394_v27, %v520_v33 }
 0x150   :  { %v1886_v34 = vmul.f32 -1.442695, %v2899_v29 }
 0x151   :  { %v1887_v37 = vmul.f32 -1.442695, %v2901_v36 }
 0x152   :  { %2960 = vpow2.f32 %v1886_v34 }
 0x153   :  { %v589_v41 = vpop.f32.mrb[8].mxu1  ;;  %2962 = vpow2.f32 %v1887_v37 }
 0x154   :  { %v2140_v42 = vpop.f32.mrb[9].mxu1  ;;  %v590_v61 = vadd.f32 %v589_v41, %v3398_v47 }
 0x15c   :  { %v2961_v43 = vpop.eup %2960 }
 0x15d   :  { %v597_v51 = vadd.f32 1.0, %v2961_v43  ;;  %v2963_v54 = vpop.eup %2962 }
 0x15e   :  { %v604_v57 = vadd.f32 1.0, %v2963_v54 }
 0x15f   :  { %2964 = vrcp.f32 %v597_v51 }
 0x160   :  { %2966 = vrcp.f32 %v604_v57 }
 0x169   :  { %v2965_v63 = vpop.eup %2964 }
 0x16a   :  { %v607_v6 = vmul.f32 %v2965_v63, %v590_v61  ;;  %v2967_v12 = vpop.eup %2966 }
 0x16b   :  { %v610_v16 = vsub.f32 1.0, %v2967_v12  ;;  %v612_v24 = vmul.f32 0.0, %v2967_v12  ;;  %v794_v12 = vpop.permute.xlu0 %793 }
 0x16c   :  { %v608_v10 = vadd.f32 %v607_v6, %v318_v4  ;;  %vm795_vm5 = vcmp.eq.s32.totalorder %v794_v12, 1 }
 0x16e   :  { %2968 = vtanh.f32 %v608_v10 }
 0x178   :  { %v2969_v17 = vpop.eup %2968 }
 0x179   :  { %v611_v21 = vmul.f32 %v2969_v17, %v610_v16 }
 0x17b   :  { %v3401_v29 = vadd.f32 %v612_v24, %v611_v21 }
 0x17d   :  { %v620_v46 = vsel %vm619_vm3, %v3401_v29, 0.0  ;;  %693 = vmatmul.mubr.f32.vlgmr.msra.gmra.mrb[2].mxu0 %v3401_v29  ;;  %2174 = vmatmul.mubr.f32.vlgmr.msra.gmra.mrb[10].mxu1 %v3401_v29 }
 0x17e   :  { %621 = vst [vmem:[#allocation9] sm:$0xff] %v620_v46  ;;  %2565 = vmatpush1.bf16.msra.mxu0 %v3235_v19  ;;  %2596 = vmatpush3.bf16.msra.mxu1 %v3263_v45 }
 0x17f   :  { %2567 = vmatprep.subr.bf16.mxu0 %v3238_v20  ;;  %2597 = vmatprep.subr.bf16.mxu1 %v3144_v44 }
 0x180   :  { %869 = vmatprep.mubr.f32.mxu0 %v3142_v0  ;;  %2208 = vmatprep.mubr.msk.f32.mxu1 %vm3145_vm1, %v3142_v0 }
 0x182   :  { %2569 = vmatpush1.bf16.msra.mxu0 %v3249_v28  ;;  %2599 = vmatpush3.bf16.msra.mxu1 %v3273_v55 }
 0x183   :  { %2571 = vmatprep.subr.bf16.mxu0 %v3253_v30  ;;  %2600 = vmatprep.subr.bf16.mxu1 %v3144_v44 }
 0x186   :  { %2573 = vmatpush1.bf16.msra.mxu0 %v3257_v38  ;;  %2602 = vmatpush3.bf16.msra.mxu1 %v3284_v3 }
 0x187   :  { %2575 = vmatprep.subr.bf16.mxu0 %v3260_v39  ;;  %2603 = vmatprep.subr.bf16.mxu1 %v3144_v44 }
 0x18a   :  { %2577 = vmatpush1.bf16.msra.mxu0 %v3267_v49  ;;  %2605 = vmatpush3.bf16.msra.mxu1 %v3295_v15 }
 0x18b   :  { %2579 = vmatprep.subr.bf16.mxu0 %v3270_v50  ;;  %2606 = vmatprep.subr.bf16.mxu1 %v3144_v44 }
 0x18e   :  { %2581 = vmatpush1.bf16.msra.mxu0 %v3278_v59  ;;  %2608 = vmatpush3.bf16.msra.mxu1 %v3306_v25 }
 0x18f   :  { %2583 = vmatprep.subr.bf16.mxu0 %v3281_v60  ;;  %2609 = vmatprep.subr.bf16.mxu1 %v3144_v44 }
 0x192   :  { %2585 = vmatpush1.bf16.msra.mxu0 %v3289_v7  ;;  %2611 = vmatpush3.bf16.msra.mxu1 %v3317_v32 }
 0x193   :  { %2587 = vmatprep.subr.bf16.mxu0 %v3292_v9  ;;  %2612 = vmatprep.subr.bf16.mxu1 %v3144_v44 }
 0x196   :  { %2589 = vmatpush1.bf16.msra.mxu0 %v3300_v18  ;;  %2614 = vmatpush3.bf16.msra.mxu1 %v3324_v35 }
 0x197   :  { %2591 = vmatprep.subr.bf16.mxu0 %v3303_v22  ;;  %2615 = vmatprep.subr.bf16.mxu1 %v3144_v44 }
 0x19a   :  { %2593 = vmatpush1.bf16.msra.mxu0 %v3313_v31  ;;  %2617 = vmatpush3.bf16.msra.mxu1 %v3332_v40 }
 0x19b   :  { %2619 = vmatprep.subr.bf16.mxu0 %v3233_v11  ;;  %2650 = vmatprep.subr.bf16.mxu1 %v3144_v44 }
 0x250   :  { %v694_v53 = vpop.f32.mrb[2].mxu0  ;;  %v765_v5 = vpop.f32.mrb[10].mxu1 }
 0x251   :  { %v2903_v33 = vadd.f32 %v3392_v23, %v694_v53  ;;  %v696_v34 = vpop.f32.mrb[3].mxu0  ;;  %v2175_v36 = vpop.f32.mrb[11].mxu1  ;;  %v766_v61 = vadd.f32 %v765_v5, %v3398_v47 }
 0x252   :  { %v2905_v41 = vadd.f32 %v3394_v27, %v696_v34 }
 0x253   :  { %v1888_v37 = vmul.f32 -1.442695, %v2903_v33 }
 0x254   :  { %v1889_v42 = vmul.f32 -1.442695, %v2905_v41 }
 0x255   :  { %2970 = vpow2.f32 %v1888_v37 }
 0x256   :  { %2972 = vpow2.f32 %v1889_v42 }
 0x25f   :  { %v2971_v43 = vpop.eup %2970 }
 0x260   :  { %v773_v51 = vadd.f32 1.0, %v2971_v43  ;;  %v2973_v54 = vpop.eup %2972 }
 0x261   :  { %v780_v57 = vadd.f32 1.0, %v2973_v54 }
 0x262   :  { %2974 = vrcp.f32 %v773_v51 }
 0x263   :  { %2976 = vrcp.f32 %v780_v57 }
 0x26c   :  { %v2975_v63 = vpop.eup %2974 }
 0x26d   :  { %v783_v4 = vmul.f32 %v2975_v63, %v766_v61  ;;  %v2977_v10 = vpop.eup %2976 }
 0x26e   :  { %v786_v14 = vsub.f32 1.0, %v2977_v10  ;;  %v788_v21 = vmul.f32 %v2977_v10, %v3401_v29 }
 0x26f   :  { %v784_v6 = vadd.f32 %v783_v4, %v3375_v52  ;;  %v1145_v52 = vsel %vm1144_vm6, 1, %v3143_v1 }
 0x270   :  { %1147 = vperm.xlu1 %2959, %v1145_v52  }
 0x271   :  { %2978 = vtanh.f32 %v784_v6  ;;  %v971_v6 = vpop.permute.xlu1 %970 }
 0x272   :  { %vm972_vm7 = vcmp.eq.s32.totalorder %v971_v6, 1 }
 0x27b   :  { %v2979_v16 = vpop.eup %2978 }
 0x27c   :  { %v787_v17 = vmul.f32 %v2979_v16, %v786_v14 }
 0x27e   :  { %v3448_v24 = vadd.f32 %v788_v21, %v787_v17 }
 0x280   :  { %v796_v46 = vsel %vm795_vm5, %v3448_v24, 0.0  ;;  %870 = vmatmul.mubr.f32.vlgmr.msra.gmra.mrb[4].mxu0 %v3448_v24  ;;  %2209 = vmatmul.mubr.f32.vlgmr.msra.gmra.mrb[12].mxu1 %v3448_v24 }
 0x281   :  { %798 = vst [vmem:[#allocation9 + $0x8] sm:$0xff] %v796_v46  ;;  %2621 = vmatpush1.bf16.msra.mxu0 %v3235_v19  ;;  %2652 = vmatpush3.bf16.msra.mxu1 %v3263_v45 }
 0x282   :  { %2623 = vmatprep.subr.bf16.mxu0 %v3238_v20  ;;  %2653 = vmatprep.subr.bf16.mxu1 %v3144_v44 }
 0x283   :  { %1046 = vmatprep.mubr.f32.mxu0 %v3142_v0  ;;  %2243 = vmatprep.mubr.msk.f32.mxu1 %vm3145_vm1, %v3142_v0 }
 0x285   :  { %2625 = vmatpush1.bf16.msra.mxu0 %v3249_v28  ;;  %2655 = vmatpush3.bf16.msra.mxu1 %v3273_v55 }
 0x286   :  { %2627 = vmatprep.subr.bf16.mxu0 %v3253_v30  ;;  %2656 = vmatprep.subr.bf16.mxu1 %v3144_v44 }
 0x289   :  { %2629 = vmatpush1.bf16.msra.mxu0 %v3257_v38  ;;  %2658 = vmatpush3.bf16.msra.mxu1 %v3284_v3 }
 0x28a   :  { %2631 = vmatprep.subr.bf16.mxu0 %v3260_v39  ;;  %2659 = vmatprep.subr.bf16.mxu1 %v3144_v44 }
 0x28d   :  { %2633 = vmatpush1.bf16.msra.mxu0 %v3267_v49  ;;  %2661 = vmatpush3.bf16.msra.mxu1 %v3295_v15 }
 0x28e   :  { %2635 = vmatprep.subr.bf16.mxu0 %v3270_v50  ;;  %2662 = vmatprep.subr.bf16.mxu1 %v3144_v44 }
 0x291   :  { %2637 = vmatpush1.bf16.msra.mxu0 %v3278_v59  ;;  %2664 = vmatpush3.bf16.msra.mxu1 %v3306_v25 }
 0x292   :  { %2639 = vmatprep.subr.bf16.mxu0 %v3281_v60  ;;  %2665 = vmatprep.subr.bf16.mxu1 %v3144_v44 }
 0x295   :  { %2641 = vmatpush1.bf16.msra.mxu0 %v3289_v7  ;;  %2667 = vmatpush3.bf16.msra.mxu1 %v3317_v32 }
 0x296   :  { %2643 = vmatprep.subr.bf16.mxu0 %v3292_v9  ;;  %2668 = vmatprep.subr.bf16.mxu1 %v3144_v44 }
 0x299   :  { %2645 = vmatpush1.bf16.msra.mxu0 %v3300_v18  ;;  %2670 = vmatpush3.bf16.msra.mxu1 %v3324_v35 }
 0x29a   :  { %2647 = vmatprep.subr.bf16.mxu0 %v3303_v22  ;;  %2671 = vmatprep.subr.bf16.mxu1 %v3144_v44 }
 0x29d   :  { %2649 = vmatpush1.bf16.msra.mxu0 %v3313_v31  ;;  %2673 = vmatpush3.bf16.msra.mxu1 %v3332_v40 }
 0x29e   :  { %2675 = vmatprep.subr.bf16.mxu0 %v3233_v11  ;;  %2706 = vmatprep.subr.bf16.mxu1 %v3144_v44 }
 0x353   :  { %v871_v29 = vpop.f32.mrb[4].mxu0  ;;  %v942_v48 = vpop.f32.mrb[12].mxu1 }
 0x354   :  { %v2907_v53 = vadd.f32 %v3392_v23, %v871_v29  ;;  %v873_v5 = vpop.f32.mrb[5].mxu0  ;;  %v2210_v33 = vpop.f32.mrb[13].mxu1  ;;  %v943_v54 = vadd.f32 %v942_v48, %v3398_v47 }
 0x355   :  { %v2909_v36 = vadd.f32 %v3394_v27, %v873_v5 }
 0x356   :  { %v1890_v34 = vmul.f32 -1.442695, %v2907_v53 }
 0x357   :  { %v1891_v37 = vmul.f32 -1.442695, %v2909_v36 }
 0x358   :  { %2980 = vpow2.f32 %v1890_v34 }
 0x359   :  { %2982 = vpow2.f32 %v1891_v37 }
 0x362   :  { %v2981_v41 = vpop.eup %2980 }
 0x363   :  { %v950_v42 = vadd.f32 1.0, %v2981_v41  ;;  %v2983_v43 = vpop.eup %2982 }
 0x364   :  { %v957_v51 = vadd.f32 1.0, %v2983_v43 }
 0x365   :  { %2984 = vrcp.f32 %v950_v42 }
 0x366   :  { %2986 = vrcp.f32 %v957_v51 }
 0x36f   :  { %v2985_v57 = vpop.eup %2984 }
 0x370   :  { %v960_v61 = vmul.f32 %v2985_v57, %v943_v54  ;;  %v2987_v4 = vpop.eup %2986 }
 0x371   :  { %v963_v10 = vsub.f32 1.0, %v2987_v4  ;;  %v965_v16 = vmul.f32 %v2987_v4, %v3448_v24 }
 0x372   :  { %v961_v63 = vadd.f32 %v960_v61, %v3379_v58  ;;  %v1322_v58 = vsel %vm1321_vm8, 1, %v3143_v1  ;;  %v1148_v61 = vpop.permute.xlu1 %1147 }
 0x373   :  { %1324 = vperm.xlu0 %2958, %v1322_v58   ;;  %vm1149_vm9 = vcmp.eq.s32.totalorder %v1148_v61, 1 }
 0x374   :  { %2988 = vtanh.f32 %v961_v63 }
 0x37e   :  { %v2989_v12 = vpop.eup %2988 }
 0x37f   :  { %v964_v14 = vmul.f32 %v2989_v12, %v963_v10 }
 0x381   :  { %v3495_v17 = vadd.f32 %v965_v16, %v964_v14 }
 0x383   :  { %v973_v21 = vsel %vm972_vm7, %v3495_v17, 0.0  ;;  %1047 = vmatmul.mubr.f32.vlgmr.msra.gmra.mrb[6].mxu0 %v3495_v17  ;;  %2244 = vmatmul.mubr.f32.vlgmr.msra.gmra.mrb[14].mxu1 %v3495_v17 }
 0x384   :  { %975 = vst [vmem:[#allocation9 + $0x10] sm:$0xff] %v973_v21  ;;  %2677 = vmatpush1.bf16.msra.mxu0 %v3235_v19  ;;  %2708 = vmatpush3.bf16.msra.mxu1 %v3263_v45 }
 0x385   :  { %2679 = vmatprep.subr.bf16.mxu0 %v3238_v20  ;;  %2709 = vmatprep.subr.bf16.mxu1 %v3144_v44 }
 0x386   :  { %1223 = vmatprep.mubr.f32.mxu0 %v3142_v0  ;;  %2278 = vmatprep.mubr.msk.f32.mxu1 %vm3145_vm1, %v3142_v0 }
 0x388   :  { %2681 = vmatpush1.bf16.msra.mxu0 %v3249_v28  ;;  %2711 = vmatpush3.bf16.msra.mxu1 %v3273_v55 }
 0x389   :  { %2683 = vmatprep.subr.bf16.mxu0 %v3253_v30  ;;  %2712 = vmatprep.subr.bf16.mxu1 %v3144_v44 }
 0x38c   :  { %2685 = vmatpush1.bf16.msra.mxu0 %v3257_v38  ;;  %2714 = vmatpush3.bf16.msra.mxu1 %v3284_v3 }
 0x38d   :  { %2687 = vmatprep.subr.bf16.mxu0 %v3260_v39  ;;  %2715 = vmatprep.subr.bf16.mxu1 %v3144_v44 }
 0x390   :  { %2689 = vmatpush1.bf16.msra.mxu0 %v3267_v49  ;;  %2717 = vmatpush3.bf16.msra.mxu1 %v3295_v15 }
 0x391   :  { %2691 = vmatprep.subr.bf16.mxu0 %v3270_v50  ;;  %2718 = vmatprep.subr.bf16.mxu1 %v3144_v44 }
 0x394   :  { %2693 = vmatpush1.bf16.msra.mxu0 %v3278_v59  ;;  %2720 = vmatpush3.bf16.msra.mxu1 %v3306_v25 }
 0x395   :  { %2695 = vmatprep.subr.bf16.mxu0 %v3281_v60  ;;  %2721 = vmatprep.subr.bf16.mxu1 %v3144_v44 }
 0x398   :  { %2697 = vmatpush1.bf16.msra.mxu0 %v3289_v7  ;;  %2723 = vmatpush3.bf16.msra.mxu1 %v3317_v32 }
 0x399   :  { %2699 = vmatprep.subr.bf16.mxu0 %v3292_v9  ;;  %2724 = vmatprep.subr.bf16.mxu1 %v3144_v44 }
 0x39c   :  { %2701 = vmatpush1.bf16.msra.mxu0 %v3300_v18  ;;  %2726 = vmatpush3.bf16.msra.mxu1 %v3324_v35 }
 0x39d   :  { %2703 = vmatprep.subr.bf16.mxu0 %v3303_v22  ;;  %2727 = vmatprep.subr.bf16.mxu1 %v3144_v44 }
 0x3a0   :  { %2705 = vmatpush1.bf16.msra.mxu0 %v3313_v31  ;;  %2729 = vmatpush3.bf16.msra.mxu1 %v3332_v40 }
 0x3a1   :  { %2731 = vmatprep.subr.bf16.mxu0 %v3233_v11  ;;  %2762 = vmatprep.subr.bf16.mxu1 %v3144_v44 }
 0x456   :  { %v1048_v24 = vpop.f32.mrb[6].mxu0  ;;  %v1119_v46 = vpop.f32.mrb[14].mxu1 }
 0x457   :  { %v2911_v52 = vadd.f32 %v3392_v23, %v1048_v24  ;;  %v1050_v29 = vpop.f32.mrb[7].mxu0  ;;  %v2245_v48 = vpop.f32.mrb[15].mxu1  ;;  %v1120_v42 = vadd.f32 %v1119_v46, %v3398_v47 }
 0x458   :  { %v2913_v5 = vadd.f32 %v3394_v27, %v1050_v29 }
 0x459   :  { %v1892_v53 = vmul.f32 -1.442695, %v2911_v52 }
 0x45a   :  { %v1893_v33 = vmul.f32 -1.442695, %v2913_v5 }
 0x45b   :  { %2990 = vpow2.f32 %v1892_v53 }
 0x45c   :  { %2992 = vpow2.f32 %v1893_v33 }
 0x465   :  { %v2991_v34 = vpop.eup %2990 }
 0x466   :  { %v1127_v36 = vadd.f32 1.0, %v2991_v34  ;;  %v2993_v37 = vpop.eup %2992 }
 0x467   :  { %v1134_v41 = vadd.f32 1.0, %v2993_v37 }
 0x468   :  { %2994 = vrcp.f32 %v1127_v36 }
 0x469   :  { %2996 = vrcp.f32 %v1134_v41 }
 0x472   :  { %v2995_v43 = vpop.eup %2994 }
 0x473   :  { %v1137_v51 = vmul.f32 %v2995_v43, %v1120_v42  ;;  %v2997_v57 = vpop.eup %2996  ;;  %v1325_v42 = vpop.permute.xlu0 %1324 }
 0x474   :  { %v1140_v63 = vsub.f32 1.0, %v2997_v57  ;;  %v1142_v10 = vmul.f32 %v2997_v57, %v3495_v17  ;;  %vm1326_vm11 = vcmp.eq.s32.totalorder %v1325_v42, 1 }
 0x475   :  { %v1138_v54 = vadd.f32 %v1137_v51, %v3377_v56  ;;  %v1499_v56 = vsel %vm1498_vm10, 1, %v3143_v1 }
 0x476   :  { %1501 = vperm.xlu1 %2959, %v1499_v56  }
 0x477   :  { %2998 = vtanh.f32 %v1138_v54 }
 0x481   :  { %v2999_v4 = vpop.eup %2998 }
 0x482   :  { %v1141_v6 = vmul.f32 %v2999_v4, %v1140_v63 }
 0x484   :  { %v3542_v12 = vadd.f32 %v1142_v10, %v1141_v6 }
 0x486   :  { %v1150_v14 = vsel %vm1149_vm9, %v3542_v12, 0.0  ;;  %1224 = vmatmul.mubr.f32.vlgmr.msra.gmra.mrb[8].mxu0 %v3542_v12  ;;  %2279 = vmatmul.mubr.f32.vlgmr.msra.gmra.mrb[16].mxu1 %v3542_v12 }
 0x487   :  { %1152 = vst [vmem:[#allocation9 + $0x18] sm:$0xff] %v1150_v14  ;;  %2733 = vmatpush1.bf16.msra.mxu0 %v3235_v19  ;;  %2764 = vmatpush3.bf16.msra.mxu1 %v3263_v45 }
 0x488   :  { %2735 = vmatprep.subr.bf16.mxu0 %v3238_v20  ;;  %2765 = vmatprep.subr.bf16.mxu1 %v3144_v44 }
 0x489   :  { %1400 = vmatprep.mubr.f32.mxu0 %v3142_v0  ;;  %2313 = vmatprep.mubr.msk.f32.mxu1 %vm3145_vm1, %v3142_v0 }
 0x48b   :  { %2737 = vmatpush1.bf16.msra.mxu0 %v3249_v28  ;;  %2767 = vmatpush3.bf16.msra.mxu1 %v3273_v55 }
 0x48c   :  { %2739 = vmatprep.subr.bf16.mxu0 %v3253_v30  ;;  %2768 = vmatprep.subr.bf16.mxu1 %v3144_v44 }
 0x48f   :  { %2741 = vmatpush1.bf16.msra.mxu0 %v3257_v38  ;;  %2770 = vmatpush3.bf16.msra.mxu1 %v3284_v3 }
 0x490   :  { %2743 = vmatprep.subr.bf16.mxu0 %v3260_v39  ;;  %2771 = vmatprep.subr.bf16.mxu1 %v3144_v44 }
 0x493   :  { %2745 = vmatpush1.bf16.msra.mxu0 %v3267_v49  ;;  %2773 = vmatpush3.bf16.msra.mxu1 %v3295_v15 }
 0x494   :  { %2747 = vmatprep.subr.bf16.mxu0 %v3270_v50  ;;  %2774 = vmatprep.subr.bf16.mxu1 %v3144_v44 }
 0x497   :  { %2749 = vmatpush1.bf16.msra.mxu0 %v3278_v59  ;;  %2776 = vmatpush3.bf16.msra.mxu1 %v3306_v25 }
 0x498   :  { %2751 = vmatprep.subr.bf16.mxu0 %v3281_v60  ;;  %2777 = vmatprep.subr.bf16.mxu1 %v3144_v44 }
 0x49b   :  { %2753 = vmatpush1.bf16.msra.mxu0 %v3289_v7  ;;  %2779 = vmatpush3.bf16.msra.mxu1 %v3317_v32 }
 0x49c   :  { %2755 = vmatprep.subr.bf16.mxu0 %v3292_v9  ;;  %2780 = vmatprep.subr.bf16.mxu1 %v3144_v44 }
 0x49f   :  { %2757 = vmatpush1.bf16.msra.mxu0 %v3300_v18  ;;  %2782 = vmatpush3.bf16.msra.mxu1 %v3324_v35 }
 0x4a0   :  { %2759 = vmatprep.subr.bf16.mxu0 %v3303_v22  ;;  %2783 = vmatprep.subr.bf16.mxu1 %v3144_v44 }
 0x4a3   :  { %2761 = vmatpush1.bf16.msra.mxu0 %v3313_v31  ;;  %2785 = vmatpush3.bf16.msra.mxu1 %v3332_v40 }
 0x4a4   :  { %2787 = vmatprep.subr.bf16.mxu0 %v3233_v11  ;;  %2818 = vmatprep.subr.bf16.mxu1 %v3144_v44 }
 0x559   :  { %v1225_v16 = vpop.f32.mrb[8].mxu0  ;;  %v1296_v17 = vpop.f32.mrb[16].mxu1 }
 0x55a   :  { %v2915_v21 = vadd.f32 %v3392_v23, %v1225_v16  ;;  %v1227_v58 = vpop.f32.mrb[9].mxu0  ;;  %v2280_v24 = vpop.f32.mrb[17].mxu1  ;;  %v1297_v33 = vadd.f32 %v1296_v17, %v3398_v47 }
 0x55b   :  { %v2917_v52 = vadd.f32 %v3394_v27, %v1227_v58 }
 0x55c   :  { %v1894_v46 = vmul.f32 -1.442695, %v2915_v21 }
 0x55d   :  { %v1895_v29 = vmul.f32 -1.442695, %v2917_v52 }
 0x55e   :  { %3000 = vpow2.f32 %v1894_v46 }
 0x55f   :  { %3002 = vpow2.f32 %v1895_v29 }
 0x568   :  { %v3001_v48 = vpop.eup %3000 }
 0x569   :  { %v1304_v53 = vadd.f32 1.0, %v3001_v48  ;;  %v3003_v5 = vpop.eup %3002 }
 0x56a   :  { %v1311_v26 = vadd.f32 1.0, %v3003_v5 }
 0x56b   :  { %3004 = vrcp.f32 %v1304_v53 }
 0x56c   :  { %3006 = vrcp.f32 %v1311_v26  ;;  %v1502_v26 = vpop.permute.xlu1 %1501 }
 0x56d   :  { %vm1503_vm13 = vcmp.eq.s32.totalorder %v1502_v26, 1 }
 0x575   :  { %v3005_v34 = vpop.eup %3004 }
 0x576   :  { %v1314_v36 = vmul.f32 %v3005_v34, %v1297_v33  ;;  %v3007_v41 = vpop.eup %3006 }
 0x577   :  { %v1317_v43 = vsub.f32 1.0, %v3007_v41  ;;  %v1319_v57 = vmul.f32 %v3007_v41, %v3542_v12 }
 0x578   :  { %v1315_v37 = vadd.f32 %v1314_v36, %v3383_v2  ;;  %v3632_v2 = vld [vmem:[%s3705_s0] sm:$0xff]  ;;  %s3146_s0 = smov [#allocation9]  }
 0x579   :  { %vm1675_vm12 = vcmp.gt.s32.totalorder %v3632_v2, 6  ;;  %vm1852_vm14 = vcmp.gt.s32.totalorder %v3632_v2, 7  ;;  %s1866_s16 = sshll.u32 %s3146_s0, 4  ;;  %s1867_s16 = int_to_ptr.vmem [resolvable:$true] %s1866_s16 }
 0x57a   :  { %3008 = vtanh.f32 %v1315_v37  ;;  %v1676_v4 = vsel %vm1675_vm12, 1, %v3143_v1  ;;  %s3107_s17 = scalar_lea.vmem %s1867_s16, 1024  ;;  %p3112_p11 = scmp.lt.s32.totalorder %s1867_s16, %s1867_s16 }
 0x57b   :  { %1678 = vperm.xlu0 %2958, %v1676_v4   ;;  %p3108_p10 = scmp.ne.s32.totalorder %s1867_s16, %s3107_s17  ;;  %p3113_p12 = scmp.lt.s32.totalorder %s3107_s17, %s3107_s17 }
 0x57d   :  { %p3114_p13 = por %p3113_p12, %p3112_p11 }
 0x57f   :  { %p3115_p0 = pnand %p3114_p13, %p3108_p10 }
 0x584   :  { %v3009_v51 = vpop.eup %3008 }
 0x585   :  { %v1318_v54 = vmul.f32 %v3009_v51, %v1317_v43 }
 0x587   :  { %v3589_v61 = vadd.f32 %v1319_v57, %v1318_v54 }
 0x589   :  { %v1327_v63 = vsel %vm1326_vm11, %v3589_v61, 0.0  ;;  %1401 = vmatmul.mubr.f32.vlgmr.msra.gmra.mrb[10].mxu0 %v3589_v61  ;;  %2314 = vmatmul.mubr.f32.vlgmr.msra.gmra.mrb[18].mxu1 %v3589_v61 }
 0x58a   :  { %1329 = vst [vmem:[#allocation9 + $0x20] sm:$0xff] %v1327_v63  ;;  %2789 = vmatpush1.bf16.msra.mxu0 %v3235_v19  ;;  %2820 = vmatpush3.bf16.msra.mxu1 %v3263_v45 }
 0x58b   :  { %2791 = vmatprep.subr.bf16.mxu0 %v3238_v20  ;;  %2821 = vmatprep.subr.bf16.mxu1 %v3144_v44 }
 0x58c   :  { %1577 = vmatprep.mubr.f32.mxu0 %v3142_v0  ;;  %2348 = vmatprep.mubr.msk.f32.mxu1 %vm3145_vm1, %v3142_v0 }
 0x58e   :  { %2793 = vmatpush1.bf16.msra.mxu0 %v3249_v28  ;;  %2823 = vmatpush3.bf16.msra.mxu1 %v3273_v55 }
 0x58f   :  { %2795 = vmatprep.subr.bf16.mxu0 %v3253_v30  ;;  %2824 = vmatprep.subr.bf16.mxu1 %v3144_v44 }
 0x592   :  { %2797 = vmatpush1.bf16.msra.mxu0 %v3257_v38  ;;  %2826 = vmatpush3.bf16.msra.mxu1 %v3284_v3 }
 0x593   :  { %2799 = vmatprep.subr.bf16.mxu0 %v3260_v39  ;;  %2827 = vmatprep.subr.bf16.mxu1 %v3144_v44 }
 0x596   :  { %2801 = vmatpush1.bf16.msra.mxu0 %v3267_v49  ;;  %2829 = vmatpush3.bf16.msra.mxu1 %v3295_v15 }
 0x597   :  { %2803 = vmatprep.subr.bf16.mxu0 %v3270_v50  ;;  %2830 = vmatprep.subr.bf16.mxu1 %v3144_v44 }
 0x59a   :  { %2805 = vmatpush1.bf16.msra.mxu0 %v3278_v59  ;;  %2832 = vmatpush3.bf16.msra.mxu1 %v3306_v25 }
 0x59b   :  { %2807 = vmatprep.subr.bf16.mxu0 %v3281_v60  ;;  %2833 = vmatprep.subr.bf16.mxu1 %v3144_v44 }
 0x59e   :  { %2809 = vmatpush1.bf16.msra.mxu0 %v3289_v7  ;;  %2835 = vmatpush3.bf16.msra.mxu1 %v3317_v32 }
 0x59f   :  { %2811 = vmatprep.subr.bf16.mxu0 %v3292_v9  ;;  %2836 = vmatprep.subr.bf16.mxu1 %v3144_v44 }
 0x5a2   :  { %2813 = vmatpush1.bf16.msra.mxu0 %v3300_v18  ;;  %2838 = vmatpush3.bf16.msra.mxu1 %v3324_v35 }
 0x5a3   :  { %2815 = vmatprep.subr.bf16.mxu0 %v3303_v22  ;;  %2839 = vmatprep.subr.bf16.mxu1 %v3144_v44 }
 0x5a6   :  { %2817 = vmatpush1.bf16.msra.mxu0 %v3313_v31  ;;  %2841 = vmatpush3.bf16.msra.mxu1 %v3332_v40 }
 0x5a7   :  { %2843 = vmatprep.subr.bf16.mxu0 %v3233_v11  ;;  %2874 = vmatprep.subr.bf16.mxu1 %v3144_v44 }
 0x65c   :  { %v1402_v6 = vpop.f32.mrb[10].mxu0  ;;  %v1473_v10 = vpop.f32.mrb[18].mxu1 }
 0x65d   :  { %v2919_v12 = vadd.f32 %v3392_v23, %v1402_v6  ;;  %v1404_v14 = vpop.f32.mrb[11].mxu0  ;;  %v2315_v56 = vpop.f32.mrb[19].mxu1  ;;  %v1474_v52 = vadd.f32 %v1473_v10, %v3398_v47 }
 0x65e   :  { %v2921_v11 = vadd.f32 %v3394_v27, %v1404_v14 }
 0x65f   :  { %v1896_v16 = vmul.f32 -1.442695, %v2919_v12 }
 0x660   :  { %v1897_v17 = vmul.f32 -1.442695, %v2921_v11 }
 0x661   :  { %3010 = vpow2.f32 %v1896_v16 }
 0x662   :  { %3012 = vpow2.f32 %v1897_v17 }
 0x66b   :  { %v3011_v21 = vpop.eup %3010 }
 0x66c   :  { %v1481_v58 = vadd.f32 1.0, %v3011_v21  ;;  %v3013_v24 = vpop.eup %3012 }
 0x66d   :  { %v1488_v46 = vadd.f32 1.0, %v3013_v24 }
 0x66e   :  { %3014 = vrcp.f32 %v1481_v58 }
 0x66f   :  { %3016 = vrcp.f32 %v1488_v46 }
 0x678   :  { %v3015_v29 = vpop.eup %3014 }
 0x679   :  { %v1491_v48 = vmul.f32 %v3015_v29, %v1474_v52  ;;  %v3017_v5 = vpop.eup %3016 }
 0x67a   :  { %v1494_v33 = vsub.f32 1.0, %v3017_v5  ;;  %v1496_v37 = vmul.f32 %v3017_v5, %v3589_v61 }
 0x67b   :  { %v1492_v53 = vadd.f32 %v1491_v48, %v3381_v62 }
 0x67d   :  { %3018 = vtanh.f32 %v1492_v53 }
 0x687   :  { %v3019_v34 = vpop.eup %3018 }
 0x688   :  { %v1495_v36 = vmul.f32 %v3019_v34, %v1494_v33 }
 0x68a   :  { %v3641_v41 = vadd.f32 %v1496_v37, %v1495_v36 }
 0x68c   :  { %v1504_v42 = vsel %vm1503_vm13, %v3641_v41, 0.0  ;;  %1578 = vmatmul.mubr.f32.vlgmr.msra.gmra.mrb[12].mxu0 %v3641_v41  ;;  %2349 = vmatmul.mubr.f32.vlgmr.msra.gmra.mrb[20].mxu1 %v3641_v41 }
 0x68d   :  { %1506 = vst [vmem:[#allocation9 + $0x28] sm:$0xff] %v1504_v42  ;;  %2845 = vmatpush1.bf16.msra.mxu0 %v3235_v19  ;;  %2876 = vmatpush3.bf16.msra.mxu1 %v3263_v45 }
 0x68e   :  { %2847 = vmatprep.subr.bf16.mxu0 %v3238_v20  ;;  %2877 = vmatprep.subr.bf16.mxu1 %v3144_v44 }
 0x68f   :  { %1754 = vmatprep.mubr.f32.mxu0 %v3142_v0  ;;  %2383 = vmatprep.mubr.msk.f32.mxu1 %vm3145_vm1, %v3142_v0  ;;  %v1853_v0 = vsel %vm1852_vm14, 1, %v3143_v1 }
 0x690   :  { %1855 = vperm.xlu1 %2959, %v1853_v0  }
 0x691   :  { %2849 = vmatpush1.bf16.msra.mxu0 %v3249_v28  ;;  %2879 = vmatpush3.bf16.msra.mxu1 %v3273_v55 }
 0x692   :  { %2851 = vmatprep.subr.bf16.mxu0 %v3253_v30  ;;  %2880 = vmatprep.subr.bf16.mxu1 %v3144_v44 }
 0x695   :  { %2853 = vmatpush1.bf16.msra.mxu0 %v3257_v38  ;;  %2882 = vmatpush3.bf16.msra.mxu1 %v3284_v3 }
 0x696   :  { %2855 = vmatprep.subr.bf16.mxu0 %v3260_v39  ;;  %2883 = vmatprep.subr.bf16.mxu1 %v3144_v44 }
 0x699   :  { %2857 = vmatpush1.bf16.msra.mxu0 %v3267_v49  ;;  %2885 = vmatpush3.bf16.msra.mxu1 %v3295_v15  ;;  %v1679_v15 = vpop.permute.xlu0 %1678 }
 0x69a   :  { %2859 = vmatprep.subr.bf16.mxu0 %v3270_v50  ;;  %2886 = vmatprep.subr.bf16.mxu1 %v3144_v44  ;;  %vm1680_vm15 = vcmp.eq.s32.totalorder %v1679_v15, 1 }
 0x69d   :  { %2861 = vmatpush1.bf16.msra.mxu0 %v3278_v59  ;;  %2888 = vmatpush3.bf16.msra.mxu1 %v3306_v25 }
 0x69e   :  { %2863 = vmatprep.subr.bf16.mxu0 %v3281_v60  ;;  %2889 = vmatprep.subr.bf16.mxu1 %v3144_v44 }
 0x6a1   :  { %2865 = vmatpush1.bf16.msra.mxu0 %v3289_v7  ;;  %2891 = vmatpush3.bf16.msra.mxu1 %v3317_v32 }
 0x6a2   :  { %2867 = vmatprep.subr.bf16.mxu0 %v3292_v9  ;;  %2892 = vmatprep.subr.bf16.mxu1 %v3144_v44 }
 0x6a5   :  { %2869 = vmatpush1.bf16.msra.mxu0 %v3300_v18  ;;  %2894 = vmatpush3.bf16.msra.mxu1 %v3324_v35 }
 0x6a6   :  { %2871 = vmatprep.subr.bf16.mxu0 %v3303_v22  ;;  %2895 = vmatprep.subr.bf16.mxu1 %v3144_v44 }
 0x6a9   :  { %2873 = vmatpush1.bf16.msra.mxu0 %v3313_v31  ;;  %2897 = vmatpush3.bf16.msra.mxu1 %v3332_v40 }
 0x75f   :  { %v1579_v19 = vpop.f32.mrb[12].mxu0  ;;  %v1650_v20 = vpop.f32.mrb[20].mxu1 }
 0x760   :  { %v2923_v28 = vadd.f32 %v3392_v23, %v1579_v19  ;;  %v1581_v30 = vpop.f32.mrb[13].mxu0  ;;  %v2350_v38 = vpop.f32.mrb[21].mxu1  ;;  %v1651_v1 = vadd.f32 %v1650_v20, %v3398_v47 }
 0x761   :  { %v2925_v45 = vadd.f32 %v3394_v27, %v1581_v30 }
 0x762   :  { %v1898_v39 = vmul.f32 -1.442695, %v2923_v28 }
 0x763   :  { %v1899_v44 = vmul.f32 -1.442695, %v2925_v45 }
 0x764   :  { %3020 = vpow2.f32 %v1898_v39 }
 0x765   :  { %3022 = vpow2.f32 %v1899_v44 }
 0x76e   :  { %v3021_v49 = vpop.eup %3020 }
 0x76f   :  { %v1658_v50 = vadd.f32 1.0, %v3021_v49  ;;  %v3023_v55 = vpop.eup %3022 }
 0x770   :  { %v1665_v59 = vadd.f32 1.0, %v3023_v55 }
 0x771   :  { %3024 = vrcp.f32 %v1658_v50 }
 0x772   :  { %3026 = vrcp.f32 %v1665_v59 }
 0x77b   :  { %v3025_v60 = vpop.eup %3024 }
 0x77c   :  { %v1668_v3 = vmul.f32 %v3025_v60, %v1651_v1  ;;  %v3027_v9 = vpop.eup %3026 }
 0x77d   :  { %v1671_v18 = vsub.f32 1.0, %v3027_v9  ;;  %v1673_v31 = vmul.f32 %v3027_v9, %v3641_v41 }
 0x77e   :  { %v1669_v7 = vadd.f32 %v1668_v3, %v3390_v13 }
 0x780   :  { %3028 = vtanh.f32 %v1669_v7 }
 0x78a   :  { %v3029_v22 = vpop.eup %3028 }
 0x78b   :  { %v1672_v25 = vmul.f32 %v3029_v22, %v1671_v18 }
 0x78d   :  { %v1674_v32 = vadd.f32 %v1673_v31, %v1672_v25 }
 0x78f   :  { %v1681_v35 = vsel %vm1680_vm15, %v1674_v32, 0.0  ;;  %1755 = vmatmul.mubr.f32.vlgmr.msra.gmra.mrb[14].mxu0 %v1674_v32  ;;  %2384 = vmatmul.mubr.f32.vlgmr.msra.gmra.mrb[22].mxu1 %v1674_v32 }
 0x790   :  { %1683 = vst [vmem:[#allocation9 + $0x30] sm:$0xff] %v1681_v35 }
 0x862   :  { %v1756_v40 = vpop.f32.mrb[14].mxu0  ;;  %v1827_v62 = vpop.f32.mrb[22].mxu1 }
 0x863   :  { %v2927_v43 = vadd.f32 %v3392_v23, %v1756_v40  ;;  %v1758_v51 = vpop.f32.mrb[15].mxu0  ;;  %v2385_v13 = vpop.f32.mrb[23].mxu1  ;;  %v1828_v10 = vadd.f32 %v1827_v62, %v3398_v47 }
 0x864   :  { %v2929_v57 = vadd.f32 %v3394_v27, %v1758_v51  ;;  %v1856_v27 = vpop.permute.xlu1 %1855 }
 0x865   :  { %v1900_v54 = vmul.f32 -1.442695, %v2927_v43  ;;  %vm1857_vm0 = vcmp.eq.s32.totalorder %v1856_v27, 1 }
 0x866   :  { %v1901_v61 = vmul.f32 -1.442695, %v2929_v57 }
 0x867   :  { %3030 = vpow2.f32 %v1900_v54 }
 0x868   :  { %3032 = vpow2.f32 %v1901_v61 }
 0x871   :  { %v3031_v63 = vpop.eup %3030 }
 0x872   :  { %v1835_v2 = vadd.f32 1.0, %v3031_v63  ;;  %v3033_v4 = vpop.eup %3032 }
 0x873   :  { %v1842_v6 = vadd.f32 1.0, %v3033_v4 }
 0x874   :  { %3034 = vrcp.f32 %v1835_v2 }
 0x875   :  { %3036 = vrcp.f32 %v1842_v6 }
 0x87e   :  { %v3035_v12 = vpop.eup %3034 }
 0x87f   :  { %v1845_v14 = vmul.f32 %v3035_v12, %v1828_v10  ;;  %v3037_v56 = vpop.eup %3036 }
 0x880   :  { %v1848_v16 = vsub.f32 1.0, %v3037_v56  ;;  %v1850_v21 = vmul.f32 %v3037_v56, %v1674_v32 }
 0x881   :  { %v1846_v23 = vadd.f32 %v1845_v14, %v3388_v8 }
 0x883   :  { %3038 = vtanh.f32 %v1846_v23 }
 0x88d   :  { %v3039_v11 = vpop.eup %3038 }
 0x88e   :  { %v1849_v17 = vmul.f32 %v3039_v11, %v1848_v16 }
 0x890   :  { %v1851_v58 = vadd.f32 %v1850_v21, %v1849_v17 }
 0x892   :  { %v1858_v24 = vsel %vm1857_vm0, %v1851_v58, 0.0 }
 0x893   :  { %1860 = vst [vmem:[#allocation9 + $0x38] sm:$0xff] %v1858_v24 }
 0x894   :  { %3118 = shalt.err (!%p3115_p0)
}
 0x895   :  { %s3119_s20 = scalar_lea.hbm %s3711_s6, 1024 }
 0x896   :  { %p3120_p1 = scmp.ne.s32.totalorder %s3711_s6, %s3119_s20  ;;  %p3123_p2 = scmp.lt.u32.totalorder %s3119_s20, %s3711_s6 }
 0x898   :  { %p3125_p3 = pnand %p3123_p2, %p3120_p1 }
 0x89a   :  { %3128 = shalt.err (!%p3125_p3)
}
 0x89b   :  { %1872 = dma.vmem_to_hbm [thread:$0]  %s1867_s16, 1024, %s3711_s6, [#allocation5], %s3139_s2, %s3139_s2, %s3140_s21  }
 0x89c   :  { %3133 = dma.done.wait [#allocation5], 1024  }
 0x89d   :  { %3134 = vsyncadd [#allocation5], 4294966272 }
 0x89e   :  { %1876 = vsyncpa [#allocation4], 1 }
 0x89f   :  { %1877 = vsyncpa [#allocation7], 1 }
 0x8a0   :  { %1878 = vsyncpa [#allocation5], 1 }

</bundles_post_ra>
